<compile_context>
chip_gen: v5e
topology: v5e:2x2
jax: 0.10.0
libtpu: 0.0.40
codegen_flags: <defaults>
</compile_context>

<pallas_src>
import functools

import jax
import jax.numpy as jnp
import numpy as np
from jax.experimental import pallas as pl
from jax.experimental.pallas import tpu as pltpu


# Off-centre tap order k -> (dy, dx); the centre tap (0,0) is handled separately.
_OFF_TAPS = tuple((dy, dx) for dy in (-1, 0, 1) for dx in (-1, 0, 1)
                  if not (dy == 0 and dx == 0))


def _tap_masks_np(H, W):
    """(8, H*W) f32 0/1 masks: 1 where off-centre tap (dy,dx) stays in-image."""
    y, x = np.meshgrid(np.arange(H), np.arange(W), indexing="ij")
    y = y.reshape(-1)
    x = x.reshape(-1)
    masks = np.empty((len(_OFF_TAPS), H * W), np.float32)
    for k, (dy, dx) in enumerate(_OFF_TAPS):
        ok = (y + dy >= 0) & (y + dy < H) & (x + dx >= 0) & (x + dx < W)
        masks[k] = ok.astype(np.float32)
    return masks


def prepare_residual_params(w1, b1, w2, b2, H, W, mxu_dtype=jnp.float32):
    """One-time weight/mask relayout, hoisted out of the per-call path."""
    C = w1.shape[0]

    def prep(w, b):
        # (Cout, Cin, 3, 3) -> (Cout, 9*Cin), tap-major columns k=(dy+1)*3+(dx+1).
        wf = jnp.transpose(w, (0, 2, 3, 1)).reshape(C, 9 * C)
        w_ctr = wf[:, 4 * C:5 * C]                                  # centre tap
        w_off = jnp.concatenate([wf[:, :4 * C], wf[:, 5 * C:]], axis=1)
        return (w_off.astype(mxu_dtype), w_ctr.astype(mxu_dtype),
                b.reshape(C, 1).astype(jnp.float32))

    w1_off, w1_ctr, b1v = prep(w1, b1)
    w2_off, w2_ctr, b2v = prep(w2, b2)
    return dict(masks=jnp.asarray(_tap_masks_np(H, W)),
                w1_off=w1_off, w1_ctr=w1_ctr, b1=b1v,
                w2_off=w2_off, w2_ctr=w2_ctr, b2=b2v)


def _residual_kernel(x_ref, m_ref, w1o_ref, w1c_ref, b1_ref,
                     w2o_ref, w2c_ref, b2_ref, o_ref, patches_ref,
                     *, nb, C, W, HW):
    masks = m_ref[...]                                   # (8, HW) f32
    w1o = w1o_ref[...]
    w1c = w1c_ref[...]
    b1 = b1_ref[...]
    w2o = w2o_ref[...]
    w2c = w2c_ref[...]
    b2 = b2_ref[...]

    def conv3x3(a, w_off, w_ctr, bias):
        # Stream the 8 off-centre taps into the persistent VMEM scratch:
        # lane roll (XLU slot, ~free) + 0/1 boundary mask implements 'same'
        # zero padding; rolls never leak across images (per-image `a`).
        for k, (dy, dx) in enumerate(_OFF_TAPS):
            d = dy * W + dx                              # flat tap offset
            patches_ref[pl.ds(k * C, C), :] = (
                pltpu.roll(a, shift=(-d) % HW, axis=1) * masks[k:k + 1, :]
            ).astype(patches_ref.dtype)
        # Main im2col dot: K = 8*C (one full pass on the 256-deep MXU) ...
        y = jnp.dot(w_off, patches_ref[...],
                    preferred_element_type=jnp.float32)
        # ... plus the centre tap as its own K = C accumulate.
        y = y + jnp.dot(w_ctr, a.astype(w_ctr.dtype),
                        preferred_element_type=jnp.float32)
        return y + bias

    # Static (unrolled) loop over the nb images of this grid step; the patches
    # scratch and resident weights are reused across images, so one grid step
    # amortises its ~0.35 us overhead over nb images.
    for i in range(nb):
        x = x_ref[i].astype(jnp.float32)                 # (C, HW), f32 math
        h = conv3x3(jnp.maximum(x, 0.0), w1o, w1c, b1)   # conv1(relu(x))
        y = conv3x3(jnp.maximum(h, 0.0), w2o, w2c, b2)   # conv2(relu(h))
        o_ref[i] = (y + x).astype(o_ref.dtype)           # + residual (pre-relu x)


def _choose_grid(N, nb_max=8):
    """(images per step, number of steps); keep >= 2 steps when N >= 2 (v7x)."""
    if N <= 1:
        return 1, 1
    num_steps = max(2, -(-N // nb_max))
    nb = -(-N // num_steps)
    num_steps = -(-N // nb)
    return nb, num_steps


def upwards_layer_residual(x_nchw, params):
    """Forward of UpwardsLayerResidual.  x: (N, C, H, W) NCHW."""
    N, C, H, W = x_nchw.shape
    HW = H * W
    masks = params["masks"]
    assert masks.shape == (8, HW), "params were prepared for a different H, W"

    nb, num_steps = _choose_grid(N)
    Np = nb * num_steps
    xf = x_nchw.reshape(N, C, HW)            # free reshape, stays NCHW order
    if Np != N:                              # pad batch up to a whole grid
        xf = jnp.concatenate(
            [xf, jnp.zeros((Np - N, C, HW), xf.dtype)], axis=0)

    mxu_dtype = params["w1_off"].dtype
    kernel = functools.partial(_residual_kernel, nb=nb, C=C, W=W, HW=HW)
    out = pl.pallas_call(
        kernel,
        out_shape=jax.ShapeDtypeStruct((Np, C, HW), x_nchw.dtype),
        grid=(num_steps,),
        in_specs=[
            pl.BlockSpec((nb, C, HW), lambda s: (s, 0, 0)),   # activations
            pl.BlockSpec((8, HW), lambda s: (0, 0)),          # tap masks
            pl.BlockSpec((C, 8 * C), lambda s: (0, 0)),       # conv1 off-centre w
            pl.BlockSpec((C, C), lambda s: (0, 0)),           # conv1 centre w
            pl.BlockSpec((C, 1), lambda s: (0, 0)),           # conv1 bias
            pl.BlockSpec((C, 8 * C), lambda s: (0, 0)),       # conv2 off-centre w
            pl.BlockSpec((C, C), lambda s: (0, 0)),           # conv2 centre w
            pl.BlockSpec((C, 1), lambda s: (0, 0)),           # conv2 bias
        ],
        out_specs=pl.BlockSpec((nb, C, HW), lambda s: (s, 0, 0)),
        scratch_shapes=[pltpu.VMEM((8 * C, HW), mxu_dtype)],  # im2col patches
        compiler_params=pltpu.CompilerParams(
            dimension_semantics=("parallel",)),               # v7x: 2 TCs busy
    )(xf, masks, params["w1_off"], params["w1_ctr"], params["b1"],
      params["w2_off"], params["w2_ctr"], params["b2"])
    if Np != N:
        out = out[:N]
    return out.reshape(N, C, H, W)


# ------------------------------ pure-JAX reference ---------------------------

def _reference(x, w1, b1, w2, b2):
    def conv(a, w, b):
        y = jax.lax.conv_general_dilated(
            a, w, window_strides=(1, 1), padding=((1, 1), (1, 1)),
            dimension_numbers=("NCHW", "OIHW", "NCHW"),
            precision=jax.lax.Precision.HIGHEST)
        return y + b.reshape(1, -1, 1, 1)
    h = conv(jax.nn.relu(x), w1, b1)
    y = conv(jax.nn.relu(h), w2, b2)
    return y + x


# ------------------------------------ main -----------------------------------

if __name__ == "__main__":
    hidden_dim = 32
    N, H, W = 2, 16, 16

    key = jax.random.PRNGKey(0)
    kx, kw1, kb1, kw2, kb2 = jax.random.split(key, 5)
    bound = float(hidden_dim * 3 * 3) ** -0.5       # PyTorch Conv2d default init
    x = jax.random.normal(kx, (N, hidden_dim, H, W), jnp.float32)
    w1 = jax.random.uniform(kw1, (hidden_dim, hidden_dim, 3, 3), jnp.float32,
                            -bound, bound)
    b1 = jax.random.uniform(kb1, (hidden_dim,), jnp.float32, -bound, bound)
    w2 = jax.random.uniform(kw2, (hidden_dim, hidden_dim, 3, 3), jnp.float32,
                            -bound, bound)
    b2 = jax.random.uniform(kb2, (hidden_dim,), jnp.float32, -bound, bound)

    # One-time param relayout (hoisted out of the per-call path).
    params = prepare_residual_params(w1, b1, w2, b2, H, W,
                                     mxu_dtype=jnp.float32)

    apply_fn = jax.jit(upwards_layer_residual)
    out = apply_fn(x, params)
    out = jax.block_until_ready(out)
    assert out.shape == (N, hidden_dim, H, W), out.shape

    ref = _reference(x, w1, b1, w2, b2)
    np.testing.assert_allclose(np.asarray(out), np.asarray(ref),
                               rtol=1e-3, atol=1e-3)
    print("KERNEL_OK")
</pallas_src>

<mosaic_0001>
module attributes {stable_mosaic.version = 11 : i64} {
  func.func @_residual_kernel(%arg0: i32, %arg1: memref<1x32x256xf32, #tpu.memory_space<vmem>>, %arg2: memref<8x256xf32, #tpu.memory_space<vmem>>, %arg3: memref<32x256xf32, #tpu.memory_space<vmem>>, %arg4: memref<32x32xf32, #tpu.memory_space<vmem>>, %arg5: memref<32x1xf32, #tpu.memory_space<vmem>>, %arg6: memref<32x256xf32, #tpu.memory_space<vmem>>, %arg7: memref<32x32xf32, #tpu.memory_space<vmem>>, %arg8: memref<32x1xf32, #tpu.memory_space<vmem>>, %arg9: memref<1x32x256xf32, #tpu.memory_space<vmem>>, %arg10: memref<256x256xf32, #tpu.memory_space<vmem>>) attributes {dimension_semantics = [#tpu.dimension_semantics<parallel>], iteration_bounds = array<i64: 2>, scalar_prefetch = 0 : i64, scratch_operands = 1 : i64, tpu.core_type = #tpu.core_type<tc>, window_params = [{transform_indices = @transform_0, window_bounds = array<i64: 1, 32, 256>}, {pipeline_mode = #tpu.pipeline_mode<synchronous>, transform_indices = @transform_1, window_bounds = array<i64: 8, 256>}, {pipeline_mode = #tpu.pipeline_mode<synchronous>, transform_indices = @transform_2, window_bounds = array<i64: 32, 256>}, {pipeline_mode = #tpu.pipeline_mode<synchronous>, transform_indices = @transform_3, window_bounds = array<i64: 32, 32>}, {pipeline_mode = #tpu.pipeline_mode<synchronous>, transform_indices = @transform_4, window_bounds = array<i64: 32, 1>}, {pipeline_mode = #tpu.pipeline_mode<synchronous>, transform_indices = @transform_5, window_bounds = array<i64: 32, 256>}, {pipeline_mode = #tpu.pipeline_mode<synchronous>, transform_indices = @transform_6, window_bounds = array<i64: 32, 32>}, {pipeline_mode = #tpu.pipeline_mode<synchronous>, transform_indices = @transform_7, window_bounds = array<i64: 32, 1>}, {transform_indices = @transform_8, window_bounds = array<i64: 1, 32, 256>}]} {
    %c0 = arith.constant 0 : index
    %c0_0 = arith.constant 0 : index
    %0 = vector.load %arg2[%c0, %c0_0] : memref<8x256xf32, #tpu.memory_space<vmem>>, vector<8x256xf32>
    %c0_1 = arith.constant 0 : index
    %c0_2 = arith.constant 0 : index
    %1 = vector.load %arg3[%c0_1, %c0_2] : memref<32x256xf32, #tpu.memory_space<vmem>>, vector<32x256xf32>
    %c0_3 = arith.constant 0 : index
    %c0_4 = arith.constant 0 : index
    %2 = vector.load %arg4[%c0_3, %c0_4] : memref<32x32xf32, #tpu.memory_space<vmem>>, vector<32x32xf32>
    %c0_5 = arith.constant 0 : index
    %c0_6 = arith.constant 0 : index
    %3 = vector.load %arg5[%c0_5, %c0_6] : memref<32x1xf32, #tpu.memory_space<vmem>>, vector<32x1xf32>
    %c0_7 = arith.constant 0 : index
    %c0_8 = arith.constant 0 : index
    %4 = vector.load %arg6[%c0_7, %c0_8] : memref<32x256xf32, #tpu.memory_space<vmem>>, vector<32x256xf32>
    %c0_9 = arith.constant 0 : index
    %c0_10 = arith.constant 0 : index
    %5 = vector.load %arg7[%c0_9, %c0_10] : memref<32x32xf32, #tpu.memory_space<vmem>>, vector<32x32xf32>
    %c0_11 = arith.constant 0 : index
    %c0_12 = arith.constant 0 : index
    %6 = vector.load %arg8[%c0_11, %c0_12] : memref<32x1xf32, #tpu.memory_space<vmem>>, vector<32x1xf32>
    %c0_13 = arith.constant 0 : index
    %c0_14 = arith.constant 0 : index
    %c0_15 = arith.constant 0 : index
    %7 = vector.load %arg1[%c0_13, %c0_14, %c0_15] : memref<1x32x256xf32, #tpu.memory_space<vmem>>, vector<1x32x256xf32>
    %8 = vector.shape_cast %7 : vector<1x32x256xf32> to vector<32x256xf32>
    %cst = arith.constant 0.000000e+00 : f32
    %9 = vector.broadcast %cst : f32 to vector<32x256xf32>
    %10 = arith.maximumf %8, %9 : vector<32x256xf32>
    %c17_i32 = arith.constant 17 : i32
    %11 = tpu.dynamic_rotate %10 by %c17_i32 dim 1 : vector<32x256xf32>, i32 -> vector<32x256xf32>
    %12 = vector.extract_strided_slice %0 {offsets = [0, 0], sizes = [1, 256], strides = [1, 1]} : vector<8x256xf32> to vector<1x256xf32>
    %13 = vector.broadcast %12 : vector<1x256xf32> to vector<32x256xf32>
    %14 = arith.mulf %11, %13 : vector<32x256xf32>
    %c0_16 = arith.constant 0 : index
    %c0_17 = arith.constant 0 : index
    %15 = vector.load %arg10[%c0_16, %c0_17] : memref<256x256xf32, #tpu.memory_space<vmem>>, vector<32x256xf32>
    tpu.vector_store %arg10[%c0_16, %c0_17], %14 {strides = array<i32>} : memref<256x256xf32, #tpu.memory_space<vmem>>, vector<32x256xf32>,
    %c16_i32 = arith.constant 16 : i32
    %16 = tpu.dynamic_rotate %10 by %c16_i32 dim 1 : vector<32x256xf32>, i32 -> vector<32x256xf32>
    %17 = vector.extract_strided_slice %0 {offsets = [1, 0], sizes = [1, 256], strides = [1, 1]} : vector<8x256xf32> to vector<1x256xf32>
    %18 = vector.broadcast %17 : vector<1x256xf32> to vector<32x256xf32>
    %19 = arith.mulf %16, %18 : vector<32x256xf32>
    %c32 = arith.constant 32 : index
    %c0_18 = arith.constant 0 : index
    %20 = vector.load %arg10[%c32, %c0_18] : memref<256x256xf32, #tpu.memory_space<vmem>>, vector<32x256xf32>
    tpu.vector_store %arg10[%c32, %c0_18], %19 {strides = array<i32>} : memref<256x256xf32, #tpu.memory_space<vmem>>, vector<32x256xf32>,
    %c15_i32 = arith.constant 15 : i32
    %21 = tpu.dynamic_rotate %10 by %c15_i32 dim 1 : vector<32x256xf32>, i32 -> vector<32x256xf32>
    %22 = vector.extract_strided_slice %0 {offsets = [2, 0], sizes = [1, 256], strides = [1, 1]} : vector<8x256xf32> to vector<1x256xf32>
    %23 = vector.broadcast %22 : vector<1x256xf32> to vector<32x256xf32>
    %24 = arith.mulf %21, %23 : vector<32x256xf32>
    %c64 = arith.constant 64 : index
    %c0_19 = arith.constant 0 : index
    %25 = vector.load %arg10[%c64, %c0_19] : memref<256x256xf32, #tpu.memory_space<vmem>>, vector<32x256xf32>
    tpu.vector_store %arg10[%c64, %c0_19], %24 {strides = array<i32>} : memref<256x256xf32, #tpu.memory_space<vmem>>, vector<32x256xf32>,
    %c1_i32 = arith.constant 1 : i32
    %26 = tpu.dynamic_rotate %10 by %c1_i32 dim 1 : vector<32x256xf32>, i32 -> vector<32x256xf32>
    %27 = vector.extract_strided_slice %0 {offsets = [3, 0], sizes = [1, 256], strides = [1, 1]} : vector<8x256xf32> to vector<1x256xf32>
    %28 = vector.broadcast %27 : vector<1x256xf32> to vector<32x256xf32>
    %29 = arith.mulf %26, %28 : vector<32x256xf32>
    %c96 = arith.constant 96 : index
    %c0_20 = arith.constant 0 : index
    %30 = vector.load %arg10[%c96, %c0_20] : memref<256x256xf32, #tpu.memory_space<vmem>>, vector<32x256xf32>
    tpu.vector_store %arg10[%c96, %c0_20], %29 {strides = array<i32>} : memref<256x256xf32, #tpu.memory_space<vmem>>, vector<32x256xf32>,
    %c255_i32 = arith.constant 255 : i32
    %31 = tpu.dynamic_rotate %10 by %c255_i32 dim 1 : vector<32x256xf32>, i32 -> vector<32x256xf32>
    %32 = vector.extract_strided_slice %0 {offsets = [4, 0], sizes = [1, 256], strides = [1, 1]} : vector<8x256xf32> to vector<1x256xf32>
    %33 = vector.broadcast %32 : vector<1x256xf32> to vector<32x256xf32>
    %34 = arith.mulf %31, %33 : vector<32x256xf32>
    %c128 = arith.constant 128 : index
    %c0_21 = arith.constant 0 : index
    %35 = vector.load %arg10[%c128, %c0_21] : memref<256x256xf32, #tpu.memory_space<vmem>>, vector<32x256xf32>
    tpu.vector_store %arg10[%c128, %c0_21], %34 {strides = array<i32>} : memref<256x256xf32, #tpu.memory_space<vmem>>, vector<32x256xf32>,
    %c241_i32 = arith.constant 241 : i32
    %36 = tpu.dynamic_rotate %10 by %c241_i32 dim 1 : vector<32x256xf32>, i32 -> vector<32x256xf32>
    %37 = vector.extract_strided_slice %0 {offsets = [5, 0], sizes = [1, 256], strides = [1, 1]} : vector<8x256xf32> to vector<1x256xf32>
    %38 = vector.broadcast %37 : vector<1x256xf32> to vector<32x256xf32>
    %39 = arith.mulf %36, %38 : vector<32x256xf32>
    %c160 = arith.constant 160 : index
    %c0_22 = arith.constant 0 : index
    %40 = vector.load %arg10[%c160, %c0_22] : memref<256x256xf32, #tpu.memory_space<vmem>>, vector<32x256xf32>
    tpu.vector_store %arg10[%c160, %c0_22], %39 {strides = array<i32>} : memref<256x256xf32, #tpu.memory_space<vmem>>, vector<32x256xf32>,
    %c240_i32 = arith.constant 240 : i32
    %41 = tpu.dynamic_rotate %10 by %c240_i32 dim 1 : vector<32x256xf32>, i32 -> vector<32x256xf32>
    %42 = vector.extract_strided_slice %0 {offsets = [6, 0], sizes = [1, 256], strides = [1, 1]} : vector<8x256xf32> to vector<1x256xf32>
    %43 = vector.broadcast %42 : vector<1x256xf32> to vector<32x256xf32>
    %44 = arith.mulf %41, %43 : vector<32x256xf32>
    %c192 = arith.constant 192 : index
    %c0_23 = arith.constant 0 : index
    %45 = vector.load %arg10[%c192, %c0_23] : memref<256x256xf32, #tpu.memory_space<vmem>>, vector<32x256xf32>
    tpu.vector_store %arg10[%c192, %c0_23], %44 {strides = array<i32>} : memref<256x256xf32, #tpu.memory_space<vmem>>, vector<32x256xf32>,
    %c239_i32 = arith.constant 239 : i32
    %46 = tpu.dynamic_rotate %10 by %c239_i32 dim 1 : vector<32x256xf32>, i32 -> vector<32x256xf32>
    %47 = vector.extract_strided_slice %0 {offsets = [7, 0], sizes = [1, 256], strides = [1, 1]} : vector<8x256xf32> to vector<1x256xf32>
    %48 = vector.broadcast %47 : vector<1x256xf32> to vector<32x256xf32>
    %49 = arith.mulf %46, %48 : vector<32x256xf32>
    %c224 = arith.constant 224 : index
    %c0_24 = arith.constant 0 : index
    %50 = vector.load %arg10[%c224, %c0_24] : memref<256x256xf32, #tpu.memory_space<vmem>>, vector<32x256xf32>
    tpu.vector_store %arg10[%c224, %c0_24], %49 {strides = array<i32>} : memref<256x256xf32, #tpu.memory_space<vmem>>, vector<32x256xf32>,
    %c0_25 = arith.constant 0 : index
    %c0_26 = arith.constant 0 : index
    %51 = vector.load %arg10[%c0_25, %c0_26] : memref<256x256xf32, #tpu.memory_space<vmem>>, vector<256x256xf32>
    %cst_27 = arith.constant dense<0.000000e+00> : vector<32x256xf32>
    %52 = tpu.matmul %1, %51, %cst_27 {dimension_numbers = #tpu.dot_dimension_numbers<[1], [0], [0], [1], [0, 0, 1, 1], [], []>} : vector<32x256xf32>, vector<256x256xf32>, vector<32x256xf32> -> vector<32x256xf32>
    %cst_28 = arith.constant dense<0.000000e+00> : vector<32x256xf32>
    %53 = tpu.matmul %2, %10, %cst_28 {dimension_numbers = #tpu.dot_dimension_numbers<[1], [0], [0], [1], [0, 0, 1, 1], [], []>} : vector<32x32xf32>, vector<32x256xf32>, vector<32x256xf32> -> vector<32x256xf32>
    %54 = arith.addf %52, %53 : vector<32x256xf32>
    %55 = vector.broadcast %3 : vector<32x1xf32> to vector<32x256xf32>
    %56 = arith.addf %54, %55 : vector<32x256xf32>
    %cst_29 = arith.constant 0.000000e+00 : f32
    %57 = vector.broadcast %cst_29 : f32 to vector<32x256xf32>
    %58 = arith.maximumf %56, %57 : vector<32x256xf32>
    %c17_i32_30 = arith.constant 17 : i32
    %59 = tpu.dynamic_rotate %58 by %c17_i32_30 dim 1 : vector<32x256xf32>, i32 -> vector<32x256xf32>
    %60 = vector.extract_strided_slice %0 {offsets = [0, 0], sizes = [1, 256], strides = [1, 1]} : vector<8x256xf32> to vector<1x256xf32>
    %61 = vector.broadcast %60 : vector<1x256xf32> to vector<32x256xf32>
    %62 = arith.mulf %59, %61 : vector<32x256xf32>
    %c0_31 = arith.constant 0 : index
    %c0_32 = arith.constant 0 : index
    %63 = vector.load %arg10[%c0_31, %c0_32] : memref<256x256xf32, #tpu.memory_space<vmem>>, vector<32x256xf32>
    tpu.vector_store %arg10[%c0_31, %c0_32], %62 {strides = array<i32>} : memref<256x256xf32, #tpu.memory_space<vmem>>, vector<32x256xf32>,
    %c16_i32_33 = arith.constant 16 : i32
    %64 = tpu.dynamic_rotate %58 by %c16_i32_33 dim 1 : vector<32x256xf32>, i32 -> vector<32x256xf32>
    %65 = vector.extract_strided_slice %0 {offsets = [1, 0], sizes = [1, 256], strides = [1, 1]} : vector<8x256xf32> to vector<1x256xf32>
    %66 = vector.broadcast %65 : vector<1x256xf32> to vector<32x256xf32>
    %67 = arith.mulf %64, %66 : vector<32x256xf32>
    %c32_34 = arith.constant 32 : index
    %c0_35 = arith.constant 0 : index
    %68 = vector.load %arg10[%c32_34, %c0_35] : memref<256x256xf32, #tpu.memory_space<vmem>>, vector<32x256xf32>
    tpu.vector_store %arg10[%c32_34, %c0_35], %67 {strides = array<i32>} : memref<256x256xf32, #tpu.memory_space<vmem>>, vector<32x256xf32>,
    %c15_i32_36 = arith.constant 15 : i32
    %69 = tpu.dynamic_rotate %58 by %c15_i32_36 dim 1 : vector<32x256xf32>, i32 -> vector<32x256xf32>
    %70 = vector.extract_strided_slice %0 {offsets = [2, 0], sizes = [1, 256], strides = [1, 1]} : vector<8x256xf32> to vector<1x256xf32>
    %71 = vector.broadcast %70 : vector<1x256xf32> to vector<32x256xf32>
    %72 = arith.mulf %69, %71 : vector<32x256xf32>
    %c64_37 = arith.constant 64 : index
    %c0_38 = arith.constant 0 : index
    %73 = vector.load %arg10[%c64_37, %c0_38] : memref<256x256xf32, #tpu.memory_space<vmem>>, vector<32x256xf32>
    tpu.vector_store %arg10[%c64_37, %c0_38], %72 {strides = array<i32>} : memref<256x256xf32, #tpu.memory_space<vmem>>, vector<32x256xf32>,
    %c1_i32_39 = arith.constant 1 : i32
    %74 = tpu.dynamic_rotate %58 by %c1_i32_39 dim 1 : vector<32x256xf32>, i32 -> vector<32x256xf32>
    %75 = vector.extract_strided_slice %0 {offsets = [3, 0], sizes = [1, 256], strides = [1, 1]} : vector<8x256xf32> to vector<1x256xf32>
    %76 = vector.broadcast %75 : vector<1x256xf32> to vector<32x256xf32>
    %77 = arith.mulf %74, %76 : vector<32x256xf32>
    %c96_40 = arith.constant 96 : index
    %c0_41 = arith.constant 0 : index
    %78 = vector.load %arg10[%c96_40, %c0_41] : memref<256x256xf32, #tpu.memory_space<vmem>>, vector<32x256xf32>
    tpu.vector_store %arg10[%c96_40, %c0_41], %77 {strides = array<i32>} : memref<256x256xf32, #tpu.memory_space<vmem>>, vector<32x256xf32>,
    %c255_i32_42 = arith.constant 255 : i32
    %79 = tpu.dynamic_rotate %58 by %c255_i32_42 dim 1 : vector<32x256xf32>, i32 -> vector<32x256xf32>
    %80 = vector.extract_strided_slice %0 {offsets = [4, 0], sizes = [1, 256], strides = [1, 1]} : vector<8x256xf32> to vector<1x256xf32>
    %81 = vector.broadcast %80 : vector<1x256xf32> to vector<32x256xf32>
    %82 = arith.mulf %79, %81 : vector<32x256xf32>
    %c128_43 = arith.constant 128 : index
    %c0_44 = arith.constant 0 : index
    %83 = vector.load %arg10[%c128_43, %c0_44] : memref<256x256xf32, #tpu.memory_space<vmem>>, vector<32x256xf32>
    tpu.vector_store %arg10[%c128_43, %c0_44], %82 {strides = array<i32>} : memref<256x256xf32, #tpu.memory_space<vmem>>, vector<32x256xf32>,
    %c241_i32_45 = arith.constant 241 : i32
    %84 = tpu.dynamic_rotate %58 by %c241_i32_45 dim 1 : vector<32x256xf32>, i32 -> vector<32x256xf32>
    %85 = vector.extract_strided_slice %0 {offsets = [5, 0], sizes = [1, 256], strides = [1, 1]} : vector<8x256xf32> to vector<1x256xf32>
    %86 = vector.broadcast %85 : vector<1x256xf32> to vector<32x256xf32>
    %87 = arith.mulf %84, %86 : vector<32x256xf32>
    %c160_46 = arith.constant 160 : index
    %c0_47 = arith.constant 0 : index
    %88 = vector.load %arg10[%c160_46, %c0_47] : memref<256x256xf32, #tpu.memory_space<vmem>>, vector<32x256xf32>
    tpu.vector_store %arg10[%c160_46, %c0_47], %87 {strides = array<i32>} : memref<256x256xf32, #tpu.memory_space<vmem>>, vector<32x256xf32>,
    %c240_i32_48 = arith.constant 240 : i32
    %89 = tpu.dynamic_rotate %58 by %c240_i32_48 dim 1 : vector<32x256xf32>, i32 -> vector<32x256xf32>
    %90 = vector.extract_strided_slice %0 {offsets = [6, 0], sizes = [1, 256], strides = [1, 1]} : vector<8x256xf32> to vector<1x256xf32>
    %91 = vector.broadcast %90 : vector<1x256xf32> to vector<32x256xf32>
    %92 = arith.mulf %89, %91 : vector<32x256xf32>
    %c192_49 = arith.constant 192 : index
    %c0_50 = arith.constant 0 : index
    %93 = vector.load %arg10[%c192_49, %c0_50] : memref<256x256xf32, #tpu.memory_space<vmem>>, vector<32x256xf32>
    tpu.vector_store %arg10[%c192_49, %c0_50], %92 {strides = array<i32>} : memref<256x256xf32, #tpu.memory_space<vmem>>, vector<32x256xf32>,
    %c239_i32_51 = arith.constant 239 : i32
    %94 = tpu.dynamic_rotate %58 by %c239_i32_51 dim 1 : vector<32x256xf32>, i32 -> vector<32x256xf32>
    %95 = vector.extract_strided_slice %0 {offsets = [7, 0], sizes = [1, 256], strides = [1, 1]} : vector<8x256xf32> to vector<1x256xf32>
    %96 = vector.broadcast %95 : vector<1x256xf32> to vector<32x256xf32>
    %97 = arith.mulf %94, %96 : vector<32x256xf32>
    %c224_52 = arith.constant 224 : index
    %c0_53 = arith.constant 0 : index
    %98 = vector.load %arg10[%c224_52, %c0_53] : memref<256x256xf32, #tpu.memory_space<vmem>>, vector<32x256xf32>
    tpu.vector_store %arg10[%c224_52, %c0_53], %97 {strides = array<i32>} : memref<256x256xf32, #tpu.memory_space<vmem>>, vector<32x256xf32>,
    %c0_54 = arith.constant 0 : index
    %c0_55 = arith.constant 0 : index
    %99 = vector.load %arg10[%c0_54, %c0_55] : memref<256x256xf32, #tpu.memory_space<vmem>>, vector<256x256xf32>
    %cst_56 = arith.constant dense<0.000000e+00> : vector<32x256xf32>
    %100 = tpu.matmul %4, %99, %cst_56 {dimension_numbers = #tpu.dot_dimension_numbers<[1], [0], [0], [1], [0, 0, 1, 1], [], []>} : vector<32x256xf32>, vector<256x256xf32>, vector<32x256xf32> -> vector<32x256xf32>
    %cst_57 = arith.constant dense<0.000000e+00> : vector<32x256xf32>
    %101 = tpu.matmul %5, %58, %cst_57 {dimension_numbers = #tpu.dot_dimension_numbers<[1], [0], [0], [1], [0, 0, 1, 1], [], []>} : vector<32x32xf32>, vector<32x256xf32>, vector<32x256xf32> -> vector<32x256xf32>
    %102 = arith.addf %100, %101 : vector<32x256xf32>
    %103 = vector.broadcast %6 : vector<32x1xf32> to vector<32x256xf32>
    %104 = arith.addf %102, %103 : vector<32x256xf32>
    %105 = arith.addf %104, %8 : vector<32x256xf32>
    %c0_58 = arith.constant 0 : index
    %c0_59 = arith.constant 0 : index
    %c0_60 = arith.constant 0 : index
    %106 = vector.load %arg9[%c0_58, %c0_59, %c0_60] : memref<1x32x256xf32, #tpu.memory_space<vmem>>, vector<1x32x256xf32>
    %107 = vector.shape_cast %106 : vector<1x32x256xf32> to vector<32x256xf32>
    %108 = vector.shape_cast %105 : vector<32x256xf32> to vector<1x32x256xf32>
    tpu.vector_store %arg9[%c0_58, %c0_59, %c0_60], %108 {strides = array<i32>} : memref<1x32x256xf32, #tpu.memory_space<vmem>>, vector<1x32x256xf32>,
    return
  }
  func.func @transform_0(%arg0: i32) -> (i32, i32, i32) {
    %c0_i32 = arith.constant 0 : i32
    %c0_i32_0 = arith.constant 0 : i32
    %c0_i32_1 = arith.constant 0 : i32
    return %arg0, %c0_i32, %c0_i32_0 : i32, i32, i32
  }
  func.func @transform_1(%arg0: i32) -> (i32, i32) {
    %c0_i32 = arith.constant 0 : i32
    %c0_i32_0 = arith.constant 0 : i32
    %c0_i32_1 = arith.constant 0 : i32
    return %c0_i32, %c0_i32_0 : i32, i32
  }
  func.func @transform_2(%arg0: i32) -> (i32, i32) {
    %c0_i32 = arith.constant 0 : i32
    %c0_i32_0 = arith.constant 0 : i32
    %c0_i32_1 = arith.constant 0 : i32
    return %c0_i32, %c0_i32_0 : i32, i32
  }
  func.func @transform_3(%arg0: i32) -> (i32, i32) {
    %c0_i32 = arith.constant 0 : i32
    %c0_i32_0 = arith.constant 0 : i32
    %c0_i32_1 = arith.constant 0 : i32
    return %c0_i32, %c0_i32_0 : i32, i32
  }
  func.func @transform_4(%arg0: i32) -> (i32, i32) {
    %c0_i32 = arith.constant 0 : i32
    %c0_i32_0 = arith.constant 0 : i32
    %c0_i32_1 = arith.constant 0 : i32
    return %c0_i32, %c0_i32_0 : i32, i32
  }
  func.func @transform_5(%arg0: i32) -> (i32, i32) {
    %c0_i32 = arith.constant 0 : i32
    %c0_i32_0 = arith.constant 0 : i32
    %c0_i32_1 = arith.constant 0 : i32
    return %c0_i32, %c0_i32_0 : i32, i32
  }
  func.func @transform_6(%arg0: i32) -> (i32, i32) {
    %c0_i32 = arith.constant 0 : i32
    %c0_i32_0 = arith.constant 0 : i32
    %c0_i32_1 = arith.constant 0 : i32
    return %c0_i32, %c0_i32_0 : i32, i32
  }
  func.func @transform_7(%arg0: i32) -> (i32, i32) {
    %c0_i32 = arith.constant 0 : i32
    %c0_i32_0 = arith.constant 0 : i32
    %c0_i32_1 = arith.constant 0 : i32
    return %c0_i32, %c0_i32_0 : i32, i32
  }
  func.func @transform_8(%arg0: i32) -> (i32, i32, i32) {
    %c0_i32 = arith.constant 0 : i32
    %c0_i32_0 = arith.constant 0 : i32
    %c0_i32_1 = arith.constant 0 : i32
    return %arg0, %c0_i32, %c0_i32_0 : i32, i32, i32
  }
}

</mosaic_0001>

<bundles_post_ra>
// kernel: upwards_layer_residual.1
= control target key start
LH: loop header
LB: loop body
LE: loop exit
PB: predicated region body
PF: predicated region fallthrough
CT: control target
= control target key end

     0   :  { %s1809_s27 = smov 0   ;;  %s2990_s0 = inlined_call_operand.vmem [shape: f32[2,32,256], index: 0, kind: input, shape index: {}]   ;;  %s2991_s1 = inlined_call_operand.vmem [shape: f32[8,256], index: 1, kind: input, shape index: {}]   ;;  %s2992_s2 = inlined_call_operand.vmem [shape: f32[32,256], index: 2, kind: input, shape index: {}]   ;;  %s2993_s3 = inlined_call_operand.vmem [shape: f32[32,32], index: 3, kind: input, shape index: {}]   ;;  %s2994_s4 = inlined_call_operand.vmem [shape: f32[32,1], index: 4, kind: input, shape index: {}]   ;;  %s2995_s5 = inlined_call_operand.vmem [shape: f32[32,256], index: 5, kind: input, shape index: {}]   ;;  %s2996_s6 = inlined_call_operand.vmem [shape: f32[32,32], index: 6, kind: input, shape index: {}]   ;;  %s2997_s7 = inlined_call_operand.vmem [shape: f32[32,1], index: 7, kind: input, shape index: {}]   ;;  %s2998_s8 = inlined_call_operand.vmem [shape: f32[2,32,256], index: 8, kind: output, shape index: {}]  }
   0x1 LB: > { %s1658_s28 = sadd.s32 4294967295, %s1753_s27   ;;  %p1662_p0 = scmp.ge.s32.totalorder %s1753_s27, 1  ;;  %s1753_s27 = sphi %s1809_s27, %s18_s27  }
   0x2   : > { %p262_p1 = scmp.lt.s32.totalorder %s1753_s27, 3 }
   0x4   : > { %p263_p2 = pnand %p1662_p0, %p262_p1 }
   0x6   : > { %266 = sbr.rel (%p263_p2) target bundleno = 885 (0x375), region = 52 }
   0xb   : > { %p296_p3 = scmp.lt.s32.totalorder %s1658_s28, 1  ;;  %s1755_s11 = smov 1   ;;  %v372_v16 = vlaneseq  ;;  %v1936_v19 = vld [vmem:[%s2991_s1] sm:$0xff]  ;;  %v1941_v20 = vld [vmem:[%s2991_s1 + $0x8] sm:$0xff]  ;;  %vm766_vm5 = vcmask 261120  }
   0xc   : > { %s1756_s12 = smov 111   ;;  %s1757_s13 = smov 15   ;;  %v1951_v21 = vperm.slane %v1936_v19, 7  ;;  %v1954_v22 = vperm.slane %v1941_v20, 7  ;;  %v1980_v32 = vperm.slane %v1936_v19, 3  ;;  %v1983_v33 = vperm.slane %v1941_v20, 3 }
   0xd   : > { %s3017_s28 = smov (!%p296_p3, %s1658_s28), 1  ;;  %s1758_s14 = smov 112   ;;  %v1931_v18 = vand.u32 127, %v372_v16 }
   0xe   : > { %s1685_s29 = sshll.u32 %s3017_s28, 6  ;;  %s1759_s15 = smov 16  }
   0xf   : > { %s1825_s10 = scalar_lea.vmem %s2990_s0, %s1685_s29  ;;  %s1760_s20 = smov 113   ;;  %vm675_vm0 = vcmp.lt.s32.totalorder %v1931_v18, 111  ;;  %vm503_vm1 = vcmp.lt.s32.totalorder %v1931_v18, 1  ;;  %vm460_vm2 = vcmp.lt.s32.totalorder %v1931_v18, 15  ;;  %vm632_vm3 = vcmp.lt.s32.totalorder %v1931_v18, 112 }
  0x10   : > { %v346_v0 = vld [vmem:[%s1825_s10 + $0x30] sm:$0xff]  ;;  %v344_v1 = vld [vmem:[%s1825_s10 + $0x20] sm:$0xff]  ;;  %v347_v2 = vld [vmem:[%s1825_s10 + $0x38] sm:$0xff]  ;;  %s1761_s21 = smov 17   ;;  %s1762_s22 = smov 127   ;;  %vm417_vm4 = vcmp.lt.s32.totalorder %v1931_v18, 16 }
  0x11   : > { %v1830_v3 = vmax.f32 %v346_v0, 0.0  ;;  %v1832_v4 = vmax.f32 %v344_v1, 0.0  ;;  %v345_v5 = vld [vmem:[%s1825_s10 + $0x28] sm:$0xff]  ;;  %v1839_v6 = vmax.f32 %v347_v2, 0.0  ;;  %v342_v7 = vld [vmem:[%s1825_s10 + $0x10] sm:$0xff]  ;;  %v343_v8 = vld [vmem:[%s1825_s10 + $0x18] sm:$0xff]  ;;  %s2968_s23 = scalar_lea.vmem %s2998_s8, %s1685_s29 }
  0x12   : > { %v1846_v9 = vmax.f32 %v345_v5, 0.0  ;;  %v340_v10 = vld [vmem:[%s1825_s10] sm:$0xff]  ;;  %v1850_v11 = vmax.f32 %v342_v7, 0.0  ;;  %v1853_v12 = vmax.f32 %v343_v8, 0.0  ;;  %v341_v14 = vld [vmem:[%s1825_s10 + $0x8] sm:$0xff]  ;;  %v2050_v7 = vperm.slane %v1941_v20, 2 }
  0x13   : > { %493 = vrot.lane.b32.xlu0 %v1830_v3, %s1755_s11  ;;  %491 = vrot.lane.b32.xlu1 %v1832_v4, %s1755_s11  ;;  %v1856_v13 = vmax.f32 %v340_v10, 0.0  ;;  %v1868_v15 = vmax.f32 %v341_v14, 0.0  ;;  %vm589_vm6 = vcmp.lt.s32.totalorder %v1931_v18, 113  ;;  %vm374_vm7 = vcmp.lt.s32.totalorder %v1931_v18, 17 }
  0x14   : > { %665 = vrot.lane.b32.xlu2 %v1830_v3, %s1756_s12  ;;  %791 = vmatpush.msra.mxu0 %v1830_v3  ;;  %vm546_vm8 = vcmp.lt.s32.totalorder %v1931_v18, 127  ;;  %v325_v18 = vld [vmem:[%s2995_s5 + $0x8] sm:$0xff] }
  0x15   : > { %820 = vmatpush.msra.mxu1 %v1839_v6 }
  0x16   : > { %792 = vmatpush.msra.mxu0 %v1832_v4 }
  0x17   : > { %821 = vmatpush.msra.mxu1 %v1846_v9 }
  0x18   : > { %793 = vmatpush.msra.mxu0 %v1850_v11 }
  0x19   : > { %822 = vmatpush.msra.mxu1 %v1853_v12 }
  0x1a   : > { %794 = vmatpush.msra.mxu0 %v1856_v13 }
  0x1b   : > { %501 = vrot.lane.b32.xlu0 %v1839_v6, %s1755_s11  ;;  %499 = vrot.lane.b32.xlu1 %v1846_v9, %s1755_s11 }
  0x1c   : > { %673 = vrot.lane.b32.xlu2 %v1839_v6, %s1756_s12  ;;  %823 = vmatpush.msra.mxu1 %v1868_v15 }
  0x23   : > { %497 = vrot.lane.b32.xlu1 %v1853_v12, %s1755_s11  ;;  %489 = vrot.lane.b32.xlu0 %v1850_v11, %s1755_s11 }
  0x24   : > { %663 = vrot.lane.b32.xlu2 %v1832_v4, %s1756_s12 }
  0x2b   : > { %671 = vrot.lane.b32.xlu0 %v1846_v9, %s1756_s12  ;;  %487 = vrot.lane.b32.xlu1 %v1856_v13, %s1755_s11 }
  0x2c   : > { %495 = vrot.lane.b32.xlu2 %v1868_v15, %s1755_s11 }
  0x33   : > { %661 = vrot.lane.b32.xlu0 %v1850_v11, %s1756_s12  ;;  %669 = vrot.lane.b32.xlu1 %v1853_v12, %s1756_s12 }
  0x34   : > { %450 = vrot.lane.b32.xlu2 %v1830_v3, %s1757_s13 }
  0x3b   : > { %458 = vrot.lane.b32.xlu0 %v1839_v6, %s1757_s13  ;;  %659 = vrot.lane.b32.xlu1 %v1856_v13, %s1756_s12 }
  0x3c   : > { %667 = vrot.lane.b32.xlu2 %v1868_v15, %s1756_s12 }
  0x43   : > { %448 = vrot.lane.b32.xlu0 %v1832_v4, %s1757_s13  ;;  %456 = vrot.lane.b32.xlu1 %v1846_v9, %s1757_s13 }
  0x44   : > { %622 = vrot.lane.b32.xlu2 %v1830_v3, %s1758_s14 }
  0x4b   : > { %630 = vrot.lane.b32.xlu0 %v1839_v6, %s1758_s14  ;;  %446 = vrot.lane.b32.xlu1 %v1850_v11, %s1757_s13 }
  0x4c   : > { %454 = vrot.lane.b32.xlu2 %v1853_v12, %s1757_s13 }
  0x53   : > { %620 = vrot.lane.b32.xlu0 %v1832_v4, %s1758_s14  ;;  %628 = vrot.lane.b32.xlu1 %v1846_v9, %s1758_s14 }
  0x54   : > { %444 = vrot.lane.b32.xlu2 %v1856_v13, %s1757_s13 }
  0x5b   : > { %452 = vrot.lane.b32.xlu0 %v1868_v15, %s1757_s13  ;;  %618 = vrot.lane.b32.xlu1 %v1850_v11, %s1758_s14 }
  0x5c   : > { %626 = vrot.lane.b32.xlu2 %v1853_v12, %s1758_s14 }
  0x63   : > { %407 = vrot.lane.b32.xlu0 %v1830_v3, %s1759_s15  ;;  %415 = vrot.lane.b32.xlu1 %v1839_v6, %s1759_s15 }
  0x64   : > { %616 = vrot.lane.b32.xlu2 %v1856_v13, %s1758_s14 }
  0x6b   : > { %624 = vrot.lane.b32.xlu0 %v1868_v15, %s1758_s14  ;;  %405 = vrot.lane.b32.xlu1 %v1832_v4, %s1759_s15 }
  0x6c   : > { %413 = vrot.lane.b32.xlu2 %v1846_v9, %s1759_s15 }
  0x6e   : > { %v666_v17 = vpop.permute.xlu2 %665 }
  0x73   : > { %579 = vrot.lane.b32.xlu0 %v1830_v3, %s1760_s20  ;;  %587 = vrot.lane.b32.xlu1 %v1839_v6, %s1760_s20 }
  0x74   : > { %403 = vrot.lane.b32.xlu2 %v1850_v11, %s1759_s15 }
  0x76   : > { %v674_v23 = vpop.permute.xlu2 %673 }
  0x77   : > { %v683_v24 = vsel %vm675_vm0, %v674_v23, %v666_v17  ;;  %v679_v25 = vsel %vm675_vm0, %v666_v17, %v674_v23 }
  0x78   : > { %v692_v26 = vmul.f32 %v1951_v21, %v679_v25  ;;  %v693_v27 = vmul.f32 %v1954_v22, %v683_v24 }
  0x7a   : > { %866 = vmatpush.msra.mxu3 %v692_v26  ;;  %924 = vmatpush.msrb.mxu1 %v693_v27 }
  0x7b   : > { %411 = vrot.lane.b32.xlu0 %v1853_v12, %s1759_s15  ;;  %577 = vrot.lane.b32.xlu1 %v1832_v4, %s1760_s20 }
  0x7c   : > { %585 = vrot.lane.b32.xlu2 %v1846_v9, %s1760_s20 }
  0x7e   : > { %v664_v28 = vpop.permute.xlu2 %663 }
  0x83   : > { %401 = vrot.lane.b32.xlu0 %v1856_v13, %s1759_s15  ;;  %409 = vrot.lane.b32.xlu1 %v1868_v15, %s1759_s15 }
  0x84   : > { %575 = vrot.lane.b32.xlu2 %v1850_v11, %s1760_s20 }
  0x85   : > { %v494_v29 = vpop.permute.xlu0 %493  ;;  %v492_v30 = vpop.permute.xlu1 %491 }
  0x86   : > { %v496_v31 = vpop.permute.xlu2 %495 }
  0x8b   : > { %583 = vrot.lane.b32.xlu0 %v1853_v12, %s1760_s20  ;;  %362 = vrot.lane.b32.xlu1 %v1830_v3, %s1761_s21 }
  0x8c   : > { %370 = vrot.lane.b32.xlu2 %v1839_v6, %s1761_s21 }
  0x8d   : > { %v502_v34 = vpop.permute.xlu0 %501  ;;  %v500_v35 = vpop.permute.xlu1 %499 }
  0x8e   : > { %v507_v36 = vsel %vm503_vm1, %v494_v29, %v502_v34  ;;  %v510_v37 = vsel %vm503_vm1, %v500_v35, %v492_v30  ;;  %v511_v38 = vsel %vm503_vm1, %v502_v34, %v494_v29  ;;  %v1993_v39 = vpop.permute.xlu2 %450  ;;  %v506_v40 = vsel %vm503_vm1, %v492_v30, %v500_v35 }
  0x8f   : > { %v520_v41 = vmul.f32 %v1980_v32, %v511_v38  ;;  %v521_v42 = vmul.f32 %v1983_v33, %v507_v36  ;;  %v518_v43 = vmul.f32 %v1980_v32, %v510_v37  ;;  %v519_v44 = vmul.f32 %v1983_v33, %v506_v40 }
  0x91   : > { %837 = vmatpush.msra.mxu2 %v520_v41  ;;  %895 = vmatpush.msrb.mxu0 %v521_v42 }
  0x93   : > { %838 = vmatpush.msra.mxu2 %v518_v43  ;;  %573 = vrot.lane.b32.xlu0 %v1856_v13, %s1760_s20 }
  0x94   : > { %581 = vrot.lane.b32.xlu1 %v1868_v15, %s1760_s20  ;;  %896 = vmatpush.msrb.mxu0 %v519_v44 }
  0x95   : > { %v498_v45 = vpop.permute.xlu1 %497  ;;  %v490_v46 = vpop.permute.xlu0 %489  ;;  %360 = vrot.lane.b32.xlu2 %v1832_v4, %s1761_s21 }
  0x96   : > { %v505_v47 = vsel %vm503_vm1, %v490_v46, %v498_v45  ;;  %v509_v48 = vsel %vm503_vm1, %v498_v45, %v490_v46  ;;  %v668_v49 = vpop.permute.xlu2 %667 }
  0x97   : > { %v516_v50 = vmul.f32 %v1980_v32, %v509_v48  ;;  %v517_v51 = vmul.f32 %v1983_v33, %v505_v47 }
  0x99   : > { %839 = vmatpush.msra.mxu2 %v516_v50  ;;  %897 = vmatpush.msrb.mxu0 %v517_v51 }
  0x9b   : > { %368 = vrot.lane.b32.xlu0 %v1846_v9, %s1761_s21 }
  0x9c   : > { %536 = vrot.lane.b32.xlu1 %v1830_v3, %s1762_s22 }
  0x9d   : > { %v672_v52 = vpop.permute.xlu0 %671  ;;  %v488_v53 = vpop.permute.xlu1 %487  ;;  %544 = vrot.lane.b32.xlu2 %v1839_v6, %s1762_s22 }
  0x9e   : > { %v678_v54 = vsel %vm675_vm0, %v664_v28, %v672_v52  ;;  %v682_v55 = vsel %vm675_vm0, %v672_v52, %v664_v28  ;;  %v504_v56 = vsel %vm503_vm1, %v488_v53, %v496_v31  ;;  %v508_v57 = vsel %vm503_vm1, %v496_v31, %v488_v53  ;;  %v623_v58 = vpop.permute.xlu2 %622 }
  0x9f   : > { %v690_v59 = vmul.f32 %v1951_v21, %v678_v54  ;;  %v691_v60 = vmul.f32 %v1954_v22, %v682_v55  ;;  %v514_v61 = vmul.f32 %v1980_v32, %v508_v57  ;;  %v515_v62 = vmul.f32 %v1983_v33, %v504_v56 }
  0xa1   : > { %867 = vmatpush.msra.mxu3 %v690_v59  ;;  %925 = vmatpush.msrb.mxu1 %v691_v60 }
  0xa2   : > { %840 = vmatpush.msra.mxu2 %v514_v61  ;;  %898 = vmatpush.msrb.mxu0 %v515_v62 }
  0xa3   : > { %358 = vrot.lane.b32.xlu0 %v1850_v11, %s1761_s21 }
  0xa4   : > { %366 = vrot.lane.b32.xlu1 %v1853_v12, %s1761_s21 }
  0xa5   : > { %v662_v63 = vpop.permute.xlu0 %661  ;;  %v670_v0 = vpop.permute.xlu1 %669  ;;  %534 = vrot.lane.b32.xlu2 %v1832_v4, %s1762_s22  ;;  %v2047_v4 = vperm.slane %v1936_v19, 2 }
  0xa6   : > { %v677_v1 = vsel %vm675_vm0, %v662_v63, %v670_v0  ;;  %v681_v2 = vsel %vm675_vm0, %v670_v0, %v662_v63  ;;  %v455_v3 = vpop.permute.xlu2 %454  ;;  %v2123_v63 = vperm.slane %v1936_v19, 1  ;;  %v2126_v0 = vperm.slane %v1941_v20, 1 }
  0xa7   : > { %v688_v5 = vmul.f32 %v1951_v21, %v677_v1  ;;  %v689_v6 = vmul.f32 %v1954_v22, %v681_v2 }
  0xa9   : > { %868 = vmatpush.msra.mxu3 %v688_v5  ;;  %926 = vmatpush.msrb.mxu1 %v689_v6 }
  0xab   : > { %542 = vrot.lane.b32.xlu0 %v1846_v9, %s1762_s22 }
  0xac   : > { %356 = vrot.lane.b32.xlu1 %v1856_v13, %s1761_s21 }
  0xad   : > { %v459_v8 = vpop.permute.xlu0 %458  ;;  %v660_v10 = vpop.permute.xlu1 %659  ;;  %364 = vrot.lane.b32.xlu2 %v1868_v15, %s1761_s21 }
  0xae   : > { %v464_v9 = vsel %vm460_vm2, %v1993_v39, %v459_v8  ;;  %v468_v14 = vsel %vm460_vm2, %v459_v8, %v1993_v39  ;;  %v676_v16 = vsel %vm675_vm0, %v660_v10, %v668_v49  ;;  %v680_v17 = vsel %vm675_vm0, %v668_v49, %v660_v10  ;;  %v445_v23 = vpop.permute.xlu2 %444 }
  0xaf   : > { %v477_v24 = vmul.f32 %v2047_v4, %v468_v14  ;;  %v478_v25 = vmul.f32 %v2050_v7, %v464_v9  ;;  %v686_v26 = vmul.f32 %v1951_v21, %v676_v16  ;;  %v687_v27 = vmul.f32 %v1954_v22, %v680_v17 }
  0xb1   : > { %841 = vmatpush.msra.mxu2 %v477_v24  ;;  %899 = vmatpush.msrb.mxu0 %v478_v25 }
  0xb2   : > { %869 = vmatpush.msra.mxu3 %v686_v26  ;;  %927 = vmatpush.msrb.mxu1 %v687_v27 }
  0xb3   : > { %532 = vrot.lane.b32.xlu0 %v1850_v11, %s1762_s22  ;;  %v2086_v11 = vperm.slane %v1936_v19, 6 }
  0xb4   : > { %540 = vrot.lane.b32.xlu1 %v1853_v12, %s1762_s22  ;;  %v2089_v12 = vperm.slane %v1941_v20, 6 }
  0xb5   : > { %v449_v28 = vpop.permute.xlu0 %448  ;;  %v457_v29 = vpop.permute.xlu1 %456  ;;  %530 = vrot.lane.b32.xlu2 %v1856_v13, %s1762_s22 }
  0xb6   : > { %v463_v30 = vsel %vm460_vm2, %v449_v28, %v457_v29  ;;  %v467_v31 = vsel %vm460_vm2, %v457_v29, %v449_v28  ;;  %v627_v36 = vpop.permute.xlu2 %626 }
  0xb7   : > { %v475_v34 = vmul.f32 %v2047_v4, %v467_v31  ;;  %v476_v35 = vmul.f32 %v2050_v7, %v463_v30  ;;  %v316_v30 = vld [vmem:[%s2993_s3] sm:$0xff]  ;;  %v2151_v31 = vperm.slane %v1936_v19, 5 }
  0xb8   : > { %1667 = vmatmul.msk.f32.vlgmr.msra.gmra.mxu0 %vm766_vm5, %v316_v30  ;;  %1671 = vmatmul.msk.f32.vlgmr.msra.gmra.mxu1 %vm766_vm5, %v316_v30  ;;  %v2227_v30 = vperm.slane %v1941_v20, 4 }
  0xb9   : > { %842 = vmatpush.msra.mxu2 %v475_v34  ;;  %900 = vmatpush.msrb.mxu0 %v476_v35  ;;  %v2154_v34 = vperm.slane %v1941_v20, 5 }
  0xba   : > { %3005 = vst [vmem:[#allocation4_spill] sm:$0xff] %v2227_v30 }
  0xbb   : > { %538 = vrot.lane.b32.xlu0 %v1868_v15, %s1762_s22 }
  0xbd   : > { %v631_v13 = vpop.permute.xlu0 %630  ;;  %v447_v37 = vpop.permute.xlu1 %446 }
  0xbe   : > { %v636_v38 = vsel %vm632_vm3, %v623_v58, %v631_v13  ;;  %v640_v39 = vsel %vm632_vm3, %v631_v13, %v623_v58  ;;  %v462_v40 = vsel %vm460_vm2, %v447_v37, %v455_v3  ;;  %v466_v15 = vsel %vm460_vm2, %v455_v3, %v447_v37  ;;  %v617_v45 = vpop.permute.xlu2 %616 }
  0xbf   : > { %v649_v41 = vmul.f32 %v2086_v11, %v636_v38  ;;  %v650_v42 = vmul.f32 %v2089_v12, %v640_v39  ;;  %v473_v43 = vmul.f32 %v2047_v4, %v466_v15  ;;  %v474_v44 = vmul.f32 %v2050_v7, %v462_v40  ;;  %v317_v15 = vld [vmem:[%s2993_s3 + $0x8] sm:$0xff] }
  0xc0   : > { %1668 = vmatmul.msk.f32.gmra.mxu0 %vm766_vm5, %v317_v15  ;;  %1672 = vmatmul.msk.f32.gmra.mxu1 %vm766_vm5, %v317_v15  ;;  %v1763_v15 = vmov 0  }
  0xc1   : > { %870 = vmatpush.msra.mxu3 %v649_v41  ;;  %928 = vmatpush.msrb.mxu1 %v650_v42 }
  0xc2   : > { %843 = vmatpush.msra.mxu2 %v473_v43  ;;  %901 = vmatpush.msrb.mxu0 %v474_v44 }
  0xc3   : > { %1736 = vset.pattern.permute.xlu1 %v1763_v15  ;;  %1738 = vset.pattern.permute.xlu0 %v1763_v15 }
  0xc4   : > { %1737 = vset.pattern.permute.xlu2 %v1763_v15 }
  0xc5   : > { %v621_v46 = vpop.permute.xlu0 %620  ;;  %v629_v47 = vpop.permute.xlu1 %628 }
  0xc6   : > { %v635_v48 = vsel %vm632_vm3, %v621_v46, %v629_v47  ;;  %v639_v49 = vsel %vm632_vm3, %v629_v47, %v621_v46  ;;  %v414_v52 = vpop.permute.xlu2 %413 }
  0xc7   : > { %v647_v50 = vmul.f32 %v2086_v11, %v635_v48  ;;  %v648_v51 = vmul.f32 %v2089_v12, %v639_v49 }
  0xc9   : > { %871 = vmatpush.msra.mxu3 %v647_v50  ;;  %929 = vmatpush.msrb.mxu1 %v648_v51  ;;  %v318_v51 = vld [vmem:[%s2993_s3 + $0x10] sm:$0xff] }
  0xca   : > { %1669 = vmatmul.msk.f32.gmra.mxu0 %vm766_vm5, %v318_v51  ;;  %1673 = vmatmul.msk.f32.gmra.mxu1 %vm766_vm5, %v318_v51 }
  0xcd   : > { %v453_v53 = vpop.permute.xlu0 %452  ;;  %v619_v54 = vpop.permute.xlu1 %618 }
  0xce   : > { %v461_v55 = vsel %vm460_vm2, %v445_v23, %v453_v53  ;;  %v465_v56 = vsel %vm460_vm2, %v453_v53, %v445_v23  ;;  %v634_v57 = vsel %vm632_vm3, %v619_v54, %v627_v36  ;;  %v638_v58 = vsel %vm632_vm3, %v627_v36, %v619_v54  ;;  %v404_v6 = vpop.permute.xlu2 %403 }
  0xcf   : > { %v471_v59 = vmul.f32 %v2047_v4, %v465_v56  ;;  %v472_v60 = vmul.f32 %v2050_v7, %v461_v55  ;;  %v645_v61 = vmul.f32 %v2086_v11, %v634_v57  ;;  %v646_v62 = vmul.f32 %v2089_v12, %v638_v58 }
  0xd1   : > { %844 = vmatpush.msra.mxu2 %v471_v59  ;;  %902 = vmatpush.msrb.mxu0 %v472_v60  ;;  %v319_v59 = vld [vmem:[%s2993_s3 + $0x18] sm:$0xff]  ;;  %v2197_v60 = vperm.slane %v1936_v19, 0 }
  0xd2   : > { %872 = vmatpush.msra.mxu3 %v645_v61  ;;  %930 = vmatpush.msrb.mxu1 %v646_v62  ;;  %v2200_v61 = vperm.slane %v1941_v20, 0 }
  0xd3   : > { %1670 = vmatmul.msk.f32.gmra.mxu0 %vm766_vm5, %v319_v59  ;;  %1674 = vmatmul.msk.f32.gmra.mxu1 %vm766_vm5, %v319_v59 }
  0xd5   : > { %v408_v1 = vpop.permute.xlu0 %407  ;;  %v416_v2 = vpop.permute.xlu1 %415 }
  0xd6   : > { %v421_v3 = vsel %vm417_vm4, %v408_v1, %v416_v2  ;;  %v425_v5 = vsel %vm417_vm4, %v416_v2, %v408_v1  ;;  %v586_v29 = vpop.permute.xlu2 %585 }
  0xd7   : > { %v434_v8 = vmul.f32 %v2123_v63, %v425_v5  ;;  %v435_v10 = vmul.f32 %v2126_v0, %v421_v3 }
  0xd9   : > { %845 = vmatpush.msra.mxu2 %v434_v8  ;;  %903 = vmatpush.msrb.mxu0 %v435_v10 }
  0xdd   : > { %v625_v9 = vpop.permute.xlu0 %624  ;;  %v406_v14 = vpop.permute.xlu1 %405 }
  0xde   : > { %v633_v16 = vsel %vm632_vm3, %v617_v45, %v625_v9  ;;  %v637_v17 = vsel %vm632_vm3, %v625_v9, %v617_v45  ;;  %v420_v23 = vsel %vm417_vm4, %v406_v14, %v414_v52  ;;  %v424_v24 = vsel %vm417_vm4, %v414_v52, %v406_v14  ;;  %v576_v40 = vpop.permute.xlu2 %575 }
  0xdf   : > { %v643_v25 = vmul.f32 %v2086_v11, %v633_v16  ;;  %v644_v26 = vmul.f32 %v2089_v12, %v637_v17  ;;  %v432_v27 = vmul.f32 %v2123_v63, %v424_v24  ;;  %v433_v28 = vmul.f32 %v2126_v0, %v420_v23 }
  0xe1   : > { %873 = vmatpush.msra.mxu3 %v643_v25  ;;  %931 = vmatpush.msrb.mxu1 %v644_v26 }
  0xe2   : > { %846 = vmatpush.msra.mxu2 %v432_v27  ;;  %904 = vmatpush.msrb.mxu0 %v433_v28 }
  0xe5   : > { %v580_v35 = vpop.permute.xlu0 %579  ;;  %v588_v36 = vpop.permute.xlu1 %587 }
  0xe6   : > { %v593_v13 = vsel %vm589_vm6, %v580_v35, %v588_v36  ;;  %v597_v37 = vsel %vm589_vm6, %v588_v36, %v580_v35  ;;  %v371_v52 = vpop.permute.xlu2 %370 }
  0xe7   : > { %v606_v38 = vmul.f32 %v2151_v31, %v593_v13  ;;  %v607_v39 = vmul.f32 %v2154_v34, %v597_v37 }
  0xe9   : > { %874 = vmatpush.msra.mxu3 %v606_v38  ;;  %932 = vmatpush.msrb.mxu1 %v607_v39  ;;  %v323_v38 = vld [vmem:[%s2994_s4 + $0x18] sm:$0xff] }
  0xea   : > { %970 = vperm.xlu1 %1736, %v323_v38   ;;  %v313_v38 = vld [vmem:[%s2992_s2 + $0x28] sm:$0xff] }
  0xed   : > { %v412_v41 = vpop.permute.xlu0 %411  ;;  %v578_v42 = vpop.permute.xlu1 %577 }
  0xee   : > { %v419_v43 = vsel %vm417_vm4, %v404_v6, %v412_v41  ;;  %v423_v44 = vsel %vm417_vm4, %v412_v41, %v404_v6  ;;  %v592_v45 = vsel %vm589_vm6, %v578_v42, %v586_v29  ;;  %v596_v46 = vsel %vm589_vm6, %v586_v29, %v578_v42 }
  0xef   : > { %v430_v47 = vmul.f32 %v2123_v63, %v423_v44  ;;  %v431_v48 = vmul.f32 %v2126_v0, %v419_v43  ;;  %v604_v49 = vmul.f32 %v2151_v31, %v592_v45  ;;  %v605_v50 = vmul.f32 %v2154_v34, %v596_v46  ;;  %v361_v8 = vpop.permute.xlu2 %360  ;;  %v320_v45 = vld [vmem:[%s2994_s4] sm:$0xff] }
  0xf0   : > { %v2224_v29 = vperm.slane %v1936_v19, 4 }
  0xf1   : > { %847 = vmatpush.msra.mxu2 %v430_v47  ;;  %905 = vmatpush.msrb.mxu0 %v431_v48 }
  0xf2   : > { %875 = vmatpush.msra.mxu3 %v604_v49  ;;  %933 = vmatpush.msrb.mxu1 %v605_v50  ;;  %3004 = vst [vmem:[#allocation3_spill] sm:$0xff] %v2224_v29 }
  0xf3   : > { %955 = vperm.xlu1 %1736, %v320_v45  }
  0xf5   : > { %v402_v53 = vpop.permute.xlu0 %401  ;;  %v410_v54 = vpop.permute.xlu1 %409 }
  0xf6   : > { %v418_v55 = vsel %vm417_vm4, %v402_v53, %v410_v54  ;;  %v422_v56 = vsel %vm417_vm4, %v410_v54, %v402_v53 }
  0xf7   : > { %v428_v57 = vmul.f32 %v2123_v63, %v422_v56  ;;  %v429_v58 = vmul.f32 %v2126_v0, %v418_v55  ;;  %v545_v28 = vpop.permute.xlu2 %544 }
  0xf9   : > { %848 = vmatpush.msra.mxu2 %v428_v57  ;;  %906 = vmatpush.msrb.mxu0 %v429_v58 }
  0xfd   : > { %v584_v62 = vpop.permute.xlu0 %583  ;;  %v363_v1 = vpop.permute.xlu1 %362 }
  0xfe   : > { %v591_v2 = vsel %vm589_vm6, %v576_v40, %v584_v62  ;;  %v595_v3 = vsel %vm589_vm6, %v584_v62, %v576_v40  ;;  %v378_v5 = vsel %vm374_vm7, %v363_v1, %v371_v52  ;;  %v382_v6 = vsel %vm374_vm7, %v371_v52, %v363_v1 }
  0xff   : > { %v602_v10 = vmul.f32 %v2151_v31, %v591_v2  ;;  %v603_v9 = vmul.f32 %v2154_v34, %v595_v3  ;;  %v391_v14 = vmul.f32 %v2197_v60, %v382_v6  ;;  %v392_v16 = vmul.f32 %v2200_v61, %v378_v5  ;;  %v535_v43 = vpop.permute.xlu2 %534  ;;  %v308_v2 = vld [vmem:[%s2992_s2] sm:$0xff]  ;;  %v321_v3 = vld [vmem:[%s2994_s4 + $0x8] sm:$0xff] }
 0x100   : > { %960 = vperm.xlu0 %1738, %v321_v3  }
 0x101   : > { %876 = vmatpush.msra.mxu3 %v602_v10  ;;  %934 = vmatpush.msrb.mxu1 %v603_v9 }
 0x102   : > { %849 = vmatpush.msra.mxu2 %v391_v14  ;;  %907 = vmatpush.msrb.mxu0 %v392_v16  ;;  %v310_v16 = vld [vmem:[%s2992_s2 + $0x10] sm:$0xff] }
 0x105   : > { %v574_v17 = vpop.permute.xlu0 %573 }
 0x106   : > { %v582_v23 = vpop.permute.xlu1 %581 }
 0x107   : > { %v590_v24 = vsel %vm589_vm6, %v574_v17, %v582_v23  ;;  %v594_v25 = vsel %vm589_vm6, %v582_v23, %v574_v17  ;;  %v365_v51 = vpop.permute.xlu2 %364  ;;  %v322_v17 = vld [vmem:[%s2994_s4 + $0x10] sm:$0xff] }
 0x108   : > { %v600_v26 = vmul.f32 %v2151_v31, %v590_v24  ;;  %v601_v27 = vmul.f32 %v2154_v34, %v594_v25  ;;  %965 = vperm.xlu2 %1737, %v322_v17  }
 0x10a   : > { %877 = vmatpush.msra.mxu3 %v600_v26  ;;  %935 = vmatpush.msrb.mxu1 %v601_v27 }
 0x10d   : > { %v369_v35 = vpop.permute.xlu0 %368 }
 0x10e   : > { %v377_v36 = vsel %vm374_vm7, %v361_v8, %v369_v35  ;;  %v381_v13 = vsel %vm374_vm7, %v369_v35, %v361_v8  ;;  %v537_v37 = vpop.permute.xlu1 %536  ;;  %v309_v35 = vld [vmem:[%s2992_s2 + $0x8] sm:$0xff] }
 0x10f   : > { %v550_v39 = vsel %vm546_vm8, %v537_v37, %v545_v28  ;;  %v554_v19 = vsel %vm546_vm8, %v545_v28, %v537_v37  ;;  %v389_v20 = vmul.f32 %v2197_v60, %v381_v13  ;;  %v390_v40 = vmul.f32 %v2200_v61, %v377_v36  ;;  %v531_v23 = vpop.permute.xlu2 %530  ;;  %v312_v36 = vld [vmem:[%s2992_s2 + $0x20] sm:$0xff]  ;;  %v311_v13 = vld [vmem:[%s2992_s2 + $0x18] sm:$0xff]  ;;  %v314_v37 = vld [vmem:[%s2992_s2 + $0x30] sm:$0xff] }
 0x110   : > { %v563_v41 = vmul.f32 %v2224_v29, %v550_v39  ;;  %v564_v42 = vmul.f32 %v2227_v30, %v554_v19  ;;  %v315_v39 = vld [vmem:[%s2992_s2 + $0x38] sm:$0xff] }
 0x111   : > { %850 = vmatpush.msra.mxu2 %v389_v20  ;;  %908 = vmatpush.msrb.mxu0 %v390_v40 }
 0x112   : > { %878 = vmatpush.msra.mxu3 %v563_v41  ;;  %936 = vmatpush.msrb.mxu1 %v564_v42 }
 0x115   : > { %v359_v44 = vpop.permute.xlu0 %358 }
 0x116   : > { %v367_v46 = vpop.permute.xlu1 %366 }
 0x117   : > { %v376_v47 = vsel %vm374_vm7, %v359_v44, %v367_v46  ;;  %v380_v48 = vsel %vm374_vm7, %v367_v46, %v359_v44 }
 0x118   : > { %v387_v49 = vmul.f32 %v2197_v60, %v380_v48  ;;  %v388_v50 = vmul.f32 %v2200_v61, %v376_v47 }
 0x11a   : > { %851 = vmatpush.msra.mxu2 %v387_v49  ;;  %909 = vmatpush.msrb.mxu0 %v388_v50 }
 0x11d   : > { %v543_v52 = vpop.permute.xlu0 %542 }
 0x11e   : > { %v549_v53 = vsel %vm546_vm8, %v535_v43, %v543_v52  ;;  %v553_v54 = vsel %vm546_vm8, %v543_v52, %v535_v43  ;;  %v357_v55 = vpop.permute.xlu1 %356 }
 0x11f   : > { %v375_v56 = vsel %vm374_vm7, %v357_v55, %v365_v51  ;;  %v379_v57 = vsel %vm374_vm7, %v365_v51, %v357_v55  ;;  %v561_v58 = vmul.f32 %v2224_v29, %v549_v53  ;;  %v562_v59 = vmul.f32 %v2227_v30, %v553_v54 }
 0x120   : > { %v385_v62 = vmul.f32 %v2197_v60, %v379_v57  ;;  %v386_v1 = vmul.f32 %v2200_v61, %v375_v56 }
 0x121   : > { %879 = vmatpush.msra.mxu3 %v561_v58  ;;  %937 = vmatpush.msrb.mxu1 %v562_v59 }
 0x122   : > { %852 = vmatpush.msra.mxu2 %v385_v62  ;;  %910 = vmatpush.msrb.mxu0 %v386_v1 }
 0x123   : > { %853 = vmatmul.f32.vlgmr.msra.gmra.mxu2 %v308_v2  ;;  %911 = vmatmul.f32.vlgmr.msrb.gmra.mxu0 %v308_v2 }
 0x125   : > { %v533_v5 = vpop.permute.xlu0 %532 }
 0x126   : > { %v541_v6 = vpop.permute.xlu1 %540 }
 0x127   : > { %v548_v8 = vsel %vm546_vm8, %v533_v5, %v541_v6  ;;  %v552_v10 = vsel %vm546_vm8, %v541_v6, %v533_v5 }
 0x128   : > { %v559_v9 = vmul.f32 %v2224_v29, %v548_v8  ;;  %v560_v14 = vmul.f32 %v2227_v30, %v552_v10 }
 0x12a   : > { %880 = vmatpush.msra.mxu3 %v559_v9  ;;  %938 = vmatpush.msrb.mxu1 %v560_v14 }
 0x12b   : > { %856 = vmatmul.f32.gmra.mxu2 %v310_v16  ;;  %914 = vmatmul.f32.gmra.mxu0 %v310_v16 }
 0x12d   : > { %v539_v24 = vpop.permute.xlu0 %538 }
 0x12e   : > { %v547_v25 = vsel %vm546_vm8, %v531_v23, %v539_v24  ;;  %v551_v26 = vsel %vm546_vm8, %v539_v24, %v531_v23 }
 0x12f   : > { %v557_v27 = vmul.f32 %v2224_v29, %v547_v25  ;;  %v558_v28 = vmul.f32 %v2227_v30, %v551_v26 }
 0x131   : > { %881 = vmatpush.msra.mxu3 %v557_v27  ;;  %939 = vmatpush.msrb.mxu1 %v558_v28 }
 0x132   : > { %882 = vmatmul.f32.vlgmr.msra.gmra.mxu3 %v309_v35  ;;  %940 = vmatmul.f32.vlgmr.msrb.gmra.mxu1 %v309_v35 }
 0x133   : > { %859 = vmatmul.f32.gmra.mxu2 %v312_v36  ;;  %917 = vmatmul.f32.gmra.mxu0 %v312_v36 }
 0x135   : > { %v796_v19 = vpop.f32.mrf.mxu0  ;;  %v825_v40 = vpop.f32.mrf.mxu1 }
 0x13a   : > { %885 = vmatmul.f32.gmra.mxu3 %v311_v13  ;;  %943 = vmatmul.f32.gmra.mxu1 %v311_v13 }
 0x13b   : > { %862 = vmatmul.f32.gmra.mxu2 %v314_v37  ;;  %920 = vmatmul.f32.gmra.mxu0 %v314_v37 }
 0x13d   : > { %v799_v20 = vpop.f32.mrf.mxu0  ;;  %v828_v41 = vpop.f32.mrf.mxu1 }
 0x142   : > { %888 = vmatmul.f32.gmra.mxu3 %v313_v38  ;;  %946 = vmatmul.f32.gmra.mxu1 %v313_v38 }
 0x147   : > { %v802_v15 = vpop.f32.mrf.mxu0  ;;  %v831_v43 = vpop.f32.mrf.mxu1 }
 0x14a   : > { %891 = vmatmul.f32.gmra.mxu3 %v315_v39  ;;  %949 = vmatmul.f32.gmra.mxu1 %v315_v39 }
 0x150   : > { %v805_v42 = vpop.f32.mrf.mxu0  ;;  %v834_v45 = vpop.f32.mrf.mxu1 }
 0x15c   : > { %v971_v46 = vpop.permute.xlu1 %970 }
 0x162   : > { %v966_v23 = vpop.permute.xlu2 %965 }
 0x165   : > { %v956_v52 = vpop.permute.xlu1 %955 }
 0x172   : > { %v961_v27 = vpop.permute.xlu0 %960 }
 0x1a0   : > { %v912_v44 = vpop.f32.mrf.mxu0 }
 0x1a1   : > { %v913_v48 = vadd.f32 %v912_v44, %v825_v40 }
 0x1a6   : > { %v854_v47 = vpop.f32.mrf.mxu2 }
 0x1a7   : > { %v855_v59 = vadd.f32 %v854_v47, %v796_v19 }
 0x1a8   : > { %v915_v49 = vpop.f32.mrf.mxu0 }
 0x1a9   : > { %v916_v14 = vadd.f32 %v915_v49, %v828_v41 }
 0x1ae   : > { %v857_v55 = vpop.f32.mrf.mxu2 }
 0x1af   : > { %v941_v50 = vpop.f32.mrf.mxu1  ;;  %v858_v37 = vadd.f32 %v857_v55, %v799_v20 }
 0x1b0   : > { %v942_v51 = vadd.f32 %v941_v50, %v913_v48  ;;  %v918_v58 = vpop.f32.mrf.mxu0 }
 0x1b1   : > { %v919_v8 = vadd.f32 %v918_v58, %v831_v43 }
 0x1b2   : > { %v974_v53 = vadd.f32 %v956_v52, %v942_v51 }
 0x1b4   : > { %v2307_v54 = vmax.f32 %v974_v53, 0.0 }
 0x1b5   : > { %v883_v56 = vpop.f32.mrf.mxu3 }
 0x1b6   : > { %1037 = vrot.lane.b32.xlu1 %v2307_v54, %s1759_s15  ;;  %1077 = vrot.lane.b32.xlu0 %v2307_v54, %s1757_s13  ;;  %v884_v62 = vadd.f32 %v883_v56, %v855_v59  ;;  %v860_v2 = vpop.f32.mrf.mxu2 }
 0x1b7   : > { %1117 = vrot.lane.b32.xlu2 %v2307_v54, %s1755_s11  ;;  %v944_v57 = vpop.f32.mrf.mxu1  ;;  %v861_v35 = vadd.f32 %v860_v2, %v802_v15 }
 0x1b8   : > { %v973_v5 = vadd.f32 %v956_v52, %v884_v62  ;;  %v921_v6 = vpop.f32.mrf.mxu0  ;;  %v945_v25 = vadd.f32 %v944_v57, %v916_v14 }
 0x1b9   : > { %v922_v16 = vadd.f32 %v921_v6, %v834_v45 }
 0x1ba   : > { %v2321_v10 = vmax.f32 %v973_v5, 0.0  ;;  %v976_v38 = vadd.f32 %v961_v27, %v945_v25 }
 0x1bc   : > { %v2340_v20 = vmax.f32 %v976_v38, 0.0 }
 0x1bd   : > { %v886_v1 = vpop.f32.mrf.mxu3 }
 0x1be   : > { %1197 = vrot.lane.b32.xlu1 %v2307_v54, %s1760_s20  ;;  %1237 = vrot.lane.b32.xlu0 %v2307_v54, %s1758_s14  ;;  %v863_v28 = vpop.f32.mrf.mxu2  ;;  %v887_v43 = vadd.f32 %v886_v1, %v858_v37 }
 0x1bf   : > { %1277 = vrot.lane.b32.xlu2 %v2307_v54, %s1756_s12  ;;  %v947_v3 = vpop.f32.mrf.mxu1  ;;  %v864_v39 = vadd.f32 %v863_v28, %v805_v42 }
 0x1c0   : > { %v948_v17 = vadd.f32 %v947_v3, %v919_v8  ;;  %v975_v47 = vadd.f32 %v961_v27, %v887_v43 }
 0x1c2   : > { %v978_v36 = vadd.f32 %v966_v23, %v948_v17  ;;  %v2350_v50 = vmax.f32 %v975_v47, 0.0 }
 0x1c4   : > { %v2331_v44 = vmax.f32 %v978_v36, 0.0 }
 0x1c5   : > { %v889_v9 = vpop.f32.mrf.mxu3 }
 0x1c6   : > { %1109 = vrot.lane.b32.xlu1 %v2321_v10, %s1755_s11  ;;  %1029 = vrot.lane.b32.xlu0 %v2321_v10, %s1759_s15  ;;  %v890_v19 = vadd.f32 %v889_v9, %v861_v35 }
 0x1c7   : > { %1069 = vrot.lane.b32.xlu2 %v2321_v10, %s1757_s13  ;;  %v950_v24 = vpop.f32.mrf.mxu1 }
 0x1c8   : > { %v951_v26 = vadd.f32 %v950_v24, %v922_v16  ;;  %v977_v15 = vadd.f32 %v966_v23, %v890_v19 }
 0x1ca   : > { %v980_v13 = vadd.f32 %v971_v46, %v951_v26  ;;  %v2346_v49 = vmax.f32 %v977_v15, 0.0 }
 0x1cc   : > { %v2329_v40 = vmax.f32 %v980_v13, 0.0 }
 0x1cd   : > { %v892_v41 = vpop.f32.mrf.mxu3 }
 0x1ce   : > { %v893_v45 = vadd.f32 %v892_v41, %v864_v39  ;;  %1426 = vmatpush.msrb.mxu3 %v2329_v40  ;;  %1269 = vrot.lane.b32.xlu1 %v2321_v10, %s1756_s12 }
 0x1cf   : > { %1189 = vrot.lane.b32.xlu0 %v2321_v10, %s1760_s20  ;;  %1229 = vrot.lane.b32.xlu2 %v2321_v10, %s1758_s14 }
 0x1d0   : > { %v979_v42 = vadd.f32 %v971_v46, %v893_v45  ;;  %1427 = vmatpush.msrb.mxu3 %v2331_v44 }
 0x1d2   : > { %v2343_v48 = vmax.f32 %v979_v42, 0.0  ;;  %1428 = vmatpush.msrb.mxu3 %v2340_v20 }
 0x1d4   : > { %1397 = vmatpush.msrb.mxu2 %v2343_v48  ;;  %1429 = vmatpush.msrb.mxu3 %v2307_v54 }
 0x1d6   : > { %1119 = vrot.lane.b32.xlu1 %v2340_v20, %s1755_s11  ;;  %1398 = vmatpush.msrb.mxu2 %v2346_v49 }
 0x1d7   : > { %1039 = vrot.lane.b32.xlu0 %v2340_v20, %s1759_s15  ;;  %1079 = vrot.lane.b32.xlu2 %v2340_v20, %s1757_s13 }
 0x1d8   : > { %1399 = vmatpush.msrb.mxu2 %v2350_v50 }
 0x1da   : > { %1400 = vmatpush.msrb.mxu2 %v2321_v10 }
 0x1de   : > { %1279 = vrot.lane.b32.xlu1 %v2340_v20, %s1756_s12 }
 0x1df   : > { %1199 = vrot.lane.b32.xlu0 %v2340_v20, %s1760_s20  ;;  %1239 = vrot.lane.b32.xlu2 %v2340_v20, %s1758_s14 }
 0x1e6   : > { %1071 = vrot.lane.b32.xlu1 %v2350_v50, %s1757_s13 }
 0x1e7   : > { %1111 = vrot.lane.b32.xlu0 %v2350_v50, %s1755_s11  ;;  %1031 = vrot.lane.b32.xlu2 %v2350_v50, %s1759_s15 }
 0x1ee   : > { %1231 = vrot.lane.b32.xlu1 %v2350_v50, %s1758_s14 }
 0x1ef   : > { %1271 = vrot.lane.b32.xlu0 %v2350_v50, %s1756_s12  ;;  %1191 = vrot.lane.b32.xlu2 %v2350_v50, %s1760_s20 }
 0x1f6   : > { %1081 = vrot.lane.b32.xlu1 %v2331_v44, %s1757_s13 }
 0x1f7   : > { %1121 = vrot.lane.b32.xlu0 %v2331_v44, %s1755_s11  ;;  %1041 = vrot.lane.b32.xlu2 %v2331_v44, %s1759_s15 }
 0x1fe   : > { %1241 = vrot.lane.b32.xlu1 %v2331_v44, %s1758_s14 }
 0x1ff   : > { %1281 = vrot.lane.b32.xlu0 %v2331_v44, %s1756_s12  ;;  %1201 = vrot.lane.b32.xlu2 %v2331_v44, %s1760_s20 }
 0x206   : > { %1033 = vrot.lane.b32.xlu1 %v2346_v49, %s1759_s15 }
 0x207   : > { %1001 = vrot.lane.b32.xlu0 %v2331_v44, %s1761_s21  ;;  %1113 = vrot.lane.b32.xlu2 %v2346_v49, %s1755_s11 }
 0x20e   : > { %1193 = vrot.lane.b32.xlu1 %v2346_v49, %s1760_s20 }
 0x20f   : > { %1073 = vrot.lane.b32.xlu0 %v2346_v49, %s1757_s13  ;;  %1273 = vrot.lane.b32.xlu2 %v2346_v49, %s1756_s12 }
 0x211   : > { %v1118_v46 = vpop.permute.xlu2 %1117 }
 0x216   : > { %1123 = vrot.lane.b32.xlu1 %v2329_v40, %s1755_s11 }
 0x217   : > { %1233 = vrot.lane.b32.xlu0 %v2346_v49, %s1758_s14  ;;  %993 = vrot.lane.b32.xlu2 %v2346_v49, %s1761_s21 }
 0x219   : > { %v1278_v51 = vpop.permute.xlu2 %1277 }
 0x21e   : > { %1043 = vrot.lane.b32.xlu1 %v2329_v40, %s1759_s15 }
 0x21f   : > { %1083 = vrot.lane.b32.xlu0 %v2329_v40, %s1757_s13  ;;  %1283 = vrot.lane.b32.xlu2 %v2329_v40, %s1756_s12 }
 0x221   : > { %v1070_v52 = vpop.permute.xlu2 %1069 }
 0x226   : > { %1203 = vrot.lane.b32.xlu1 %v2329_v40, %s1760_s20 }
 0x227   : > { %1243 = vrot.lane.b32.xlu0 %v2329_v40, %s1758_s14  ;;  %1003 = vrot.lane.b32.xlu2 %v2329_v40, %s1761_s21 }
 0x228   : > { %v1038_v53 = vpop.permute.xlu1 %1037  ;;  %v1078_v55 = vpop.permute.xlu0 %1077 }
 0x229   : > { %v2423_v56 = vsel %vm460_vm2, %v1070_v52, %v1078_v55  ;;  %v2427_v57 = vsel %vm460_vm2, %v1078_v55, %v1070_v52  ;;  %v1230_v58 = vpop.permute.xlu2 %1229 }
 0x22e   : > { %1275 = vrot.lane.b32.xlu1 %v2343_v48, %s1756_s12 }
 0x22f   : > { %1163 = vrot.lane.b32.xlu2 %v2329_v40, %s1762_s22  ;;  %1035 = vrot.lane.b32.xlu0 %v2343_v48, %s1759_s15 }
 0x230   : > { %v1198_v59 = vpop.permute.xlu1 %1197  ;;  %v1238_v62 = vpop.permute.xlu0 %1237 }
 0x231   : > { %v2437_v1 = vsel %vm632_vm3, %v1230_v58, %v1238_v62  ;;  %v2441_v2 = vsel %vm632_vm3, %v1238_v62, %v1230_v58  ;;  %v1080_v3 = vpop.permute.xlu2 %1079  ;;  %v337_v58 = vld [vmem:[%s2997_s7 + $0x8] sm:$0xff] }
 0x236   : > { %995 = vrot.lane.b32.xlu1 %v2343_v48, %s1761_s21 }
 0x237   : > { %1195 = vrot.lane.b32.xlu0 %v2343_v48, %s1760_s20  ;;  %1115 = vrot.lane.b32.xlu2 %v2343_v48, %s1755_s11 }
 0x238   : > { %v1110_v5 = vpop.permute.xlu1 %1109  ;;  %v1030_v6 = vpop.permute.xlu0 %1029 }
 0x239   : > { %v2451_v8 = vsel %vm503_vm1, %v1110_v5, %v1118_v46  ;;  %v2455_v9 = vsel %vm503_vm1, %v1118_v46, %v1110_v5  ;;  %v2459_v14 = vsel %vm417_vm4, %v1030_v6, %v1038_v53  ;;  %v2463_v16 = vsel %vm417_vm4, %v1038_v53, %v1030_v6  ;;  %v1240_v17 = vpop.permute.xlu2 %1239 }
 0x23e   : > { %1155 = vrot.lane.b32.xlu1 %v2343_v48, %s1762_s22 }
 0x23f   : > { %991 = vrot.lane.b32.xlu0 %v2350_v50, %s1761_s21  ;;  %1075 = vrot.lane.b32.xlu2 %v2343_v48, %s1757_s13 }
 0x240   : > { %v1270_v23 = vpop.permute.xlu1 %1269 }
 0x241   : > { %v2473_v24 = vsel %vm675_vm0, %v1270_v23, %v1278_v51  ;;  %v2477_v25 = vsel %vm675_vm0, %v1278_v51, %v1270_v23  ;;  %v1190_v26 = vpop.permute.xlu0 %1189  ;;  %v1032_v27 = vpop.permute.xlu2 %1031 }
 0x242   : > { %v2481_v28 = vsel %vm589_vm6, %v1190_v26, %v1198_v59  ;;  %v2485_v35 = vsel %vm589_vm6, %v1198_v59, %v1190_v26 }
 0x243   : > { %3006 = vst [vmem:[#allocation5_spill] sm:$0xff] %v2481_v28 }
 0x244   : > { %3007 = vst [vmem:[#allocation6_spill] sm:$0xff] %v2485_v35 }
 0x246   : > { %999 = vrot.lane.b32.xlu1 %v2340_v20, %s1761_s21 }
 0x247   : > { %1161 = vrot.lane.b32.xlu0 %v2331_v44, %s1762_s22  ;;  %1235 = vrot.lane.b32.xlu2 %v2343_v48, %s1758_s14 }
 0x248   : > { %v2493_v36 = vpop.permute.xlu1 %1119 }
 0x249   : > { %v1040_v13 = vpop.permute.xlu0 %1039  ;;  %v1192_v37 = vpop.permute.xlu2 %1191 }
 0x24a   : > { %v2497_v38 = vsel %vm417_vm4, %v1032_v27, %v1040_v13  ;;  %v2501_v39 = vsel %vm417_vm4, %v1040_v13, %v1032_v27 }
 0x24e   : > { %989 = vrot.lane.b32.xlu1 %v2321_v10, %s1761_s21 }
 0x24f   : > { %1151 = vrot.lane.b32.xlu0 %v2350_v50, %s1762_s22  ;;  %1153 = vrot.lane.b32.xlu2 %v2346_v49, %s1762_s22 }
 0x250   : > { %v1280_v19 = vpop.permute.xlu1 %1279 }
 0x251   : > { %v1200_v40 = vpop.permute.xlu0 %1199  ;;  %v2509_v41 = vpop.permute.xlu2 %1041 }
 0x252   : > { %v2513_v43 = vsel %vm589_vm6, %v1192_v37, %v1200_v40  ;;  %v2517_v44 = vsel %vm589_vm6, %v1200_v40, %v1192_v37  ;;  %v332_v40 = vld [vmem:[%s2996_s6] sm:$0xff] }
 0x253   : > { %3008 = vst [vmem:[#allocation7_spill] sm:$0xff] %v2517_v44  ;;  %1675 = vmatmul.msk.f32.vlgmr.msrb.gmra.mxu2 %vm766_vm5, %v332_v40  ;;  %1679 = vmatmul.msk.f32.vlgmr.msrb.gmra.mxu3 %vm766_vm5, %v332_v40 }
 0x256   : > { %1159 = vrot.lane.b32.xlu1 %v2340_v20, %s1762_s22  ;;  %v336_v20 = vld [vmem:[%s2997_s7] sm:$0xff] }
 0x257   : > { %1157 = vrot.lane.b32.xlu0 %v2307_v54, %s1762_s22  ;;  %997 = vrot.lane.b32.xlu2 %v2307_v54, %s1761_s21  ;;  %v338_v54 = vld [vmem:[%s2997_s7 + $0x10] sm:$0xff] }
 0x258   : > { %v1072_v45 = vpop.permute.xlu1 %1071 }
 0x259   : > { %v2527_v15 = vsel %vm460_vm2, %v1072_v45, %v1080_v3  ;;  %v2531_v42 = vsel %vm460_vm2, %v1080_v3, %v1072_v45  ;;  %v1112_v47 = vpop.permute.xlu0 %1111  ;;  %v2533_v48 = vpop.permute.xlu2 %1201 }
 0x25a   : > { %v1130_v44 = vsel %vm503_vm1, %v2493_v36, %v1112_v47 }
 0x25e   : > { %1561 = vperm.xlu1 %1736, %v336_v20  }
 0x25f   : > { %1571 = vperm.xlu0 %1738, %v338_v54   ;;  %1149 = vrot.lane.b32.xlu2 %v2321_v10, %s1762_s22  ;;  %v339_v10 = vld [vmem:[%s2997_s7 + $0x18] sm:$0xff] }
 0x260   : > { %v1232_v49 = vpop.permute.xlu1 %1231 }
 0x261   : > { %v2545_v50 = vsel %vm632_vm3, %v1232_v49, %v1240_v17  ;;  %v2549_v46 = vsel %vm632_vm3, %v1240_v17, %v1232_v49  ;;  %v1272_v51 = vpop.permute.xlu0 %1271  ;;  %v1114_v52 = vpop.permute.xlu2 %1113  ;;  %v333_v49 = vld [vmem:[%s2996_s6 + $0x8] sm:$0xff] }
 0x262   : > { %v2553_v53 = vsel %vm675_vm0, %v1272_v51, %v1280_v19  ;;  %v2557_v55 = vsel %vm675_vm0, %v1280_v19, %v1272_v51  ;;  %1676 = vmatmul.msk.f32.gmra.mxu2 %vm766_vm5, %v333_v49  ;;  %1680 = vmatmul.msk.f32.gmra.mxu3 %vm766_vm5, %v333_v49  ;;  %v1126_v49 = vsel %vm503_vm1, %v1112_v47, %v2493_v36 }
 0x266   : > { %1576 = vperm.xlu1 %1736, %v339_v10  }
 0x267   : > { %1566 = vperm.xlu2 %1737, %v337_v58  }
 0x268   : > { %v1082_v59 = vpop.permute.xlu1 %1081 }
 0x269   : > { %v1122_v62 = vpop.permute.xlu0 %1121  ;;  %v2565_v3 = vpop.permute.xlu2 %1273 }
 0x26a   : > { %v1127_v30 = vsel %vm503_vm1, %v1114_v52, %v1122_v62  ;;  %v1131_v40 = vsel %vm503_vm1, %v1122_v62, %v1114_v52 }
 0x26b   : > { %v1137_v52 = vmul.f32 %v1131_v40, %v1980_v32  ;;  %v2617_v62 = vmul.f32 %v1127_v30, %v1983_v33  ;;  %v1133_v30 = vmul.f32 %v2455_v9, %v1980_v32 }
 0x270   : > { %v2567_v5 = vpop.permute.xlu1 %1241 }
 0x271   : > { %v2569_v6 = vpop.permute.xlu0 %1281  ;;  %v2571_v17 = vpop.permute.xlu2 %993 }
 0x278   : > { %v2573_v23 = vpop.permute.xlu1 %1033 }
 0x279   : > { %v2575_v26 = vpop.permute.xlu0 %1001  ;;  %v2577_v27 = vpop.permute.xlu2 %1283 }
 0x280   : > { %v2579_v13 = vpop.permute.xlu1 %1193 }
 0x281   : > { %v1074_v37 = vpop.permute.xlu0 %1073  ;;  %v2581_v19 = vpop.permute.xlu2 %1003 }
 0x282   : > { %v1091_v40 = vsel %vm460_vm2, %v1082_v59, %v1074_v37 }
 0x283   : > { %v1097_v9 = vmul.f32 %v1091_v40, %v2047_v4  ;;  %v1047_v40 = vsel %vm417_vm4, %v2573_v23, %v2509_v41 }
 0x288   : > { %v1124_v45 = vpop.permute.xlu1 %1123 }
 0x289   : > { %v2588_v20 = vpop.permute.xlu0 %1233  ;;  %v2590_v54 = vpop.permute.xlu2 %1163 }
 0x28a   : > { %3009 = vst [vmem:[#allocation8_spill] sm:$0xff] %v2590_v54 }
 0x290   : > { %v1044_v51 = vpop.permute.xlu1 %1043 }
 0x291   : > { %v1084_v10 = vpop.permute.xlu0 %1083  ;;  %v1116_v58 = vpop.permute.xlu2 %1115 }
 0x292   : > { %v1128_v29 = vsel %vm503_vm1, %v1116_v58, %v1124_v45  ;;  %v1132_v35 = vsel %vm503_vm1, %v1124_v45, %v1116_v58  ;;  %v2625_v45 = vmul.f32 %v1126_v49, %v1983_v33  ;;  %v1087_v58 = vsel %vm460_vm2, %v1074_v37, %v1082_v59  ;;  %v335_v59 = vld [vmem:[%s2996_s6 + $0x18] sm:$0xff] }
 0x293   : > { %v1139_v28 = vmul.f32 %v1132_v35, %v1980_v32  ;;  %v2607_v54 = vmul.f32 %v1128_v29, %v1983_v33  ;;  %v334_v29 = vld [vmem:[%s2996_s6 + $0x10] sm:$0xff]  ;;  %v1135_v35 = vmul.f32 %v1130_v44, %v1980_v32  ;;  %v1093_v37 = vmul.f32 %v2427_v57, %v2047_v4 }
 0x294   : > { %1677 = vmatmul.msk.f32.gmra.mxu2 %vm766_vm5, %v334_v29  ;;  %1681 = vmatmul.msk.f32.gmra.mxu3 %vm766_vm5, %v334_v29  ;;  %v2668_v29 = vmul.f32 %v2527_v15, %v2050_v7 }
 0x295   : > { %1443 = vmatpush.msra.mxu0 %v1139_v28  ;;  %1687 = vmatpush.msra.mxu2 %v2607_v54  ;;  %v2636_v28 = vmul.f32 %v2451_v8, %v1983_v33 }
 0x297   : > { %1444 = vmatpush.msra.mxu0 %v1137_v52  ;;  %1688 = vmatpush.msra.mxu2 %v2617_v62  ;;  %v2656_v52 = vmul.f32 %v1087_v58, %v2050_v7 }
 0x298   : > { %v2628_v36 = vpop.permute.xlu1 %1203 }
 0x299   : > { %v2638_v44 = vpop.permute.xlu0 %1243  ;;  %1445 = vmatpush.msra.mxu0 %v1135_v35  ;;  %v1076_v47 = vpop.permute.xlu2 %1075  ;;  %1689 = vmatpush.msra.mxu2 %v2625_v45  ;;  %v2673_v35 = vmul.f32 %v2423_v56, %v2050_v7 }
 0x29a   : > { %v1088_v49 = vsel %vm460_vm2, %v1076_v47, %v1084_v10  ;;  %v1092_v32 = vsel %vm460_vm2, %v1084_v10, %v1076_v47  ;;  %v1095_v10 = vmul.f32 %v2531_v42, %v2047_v4 }
 0x29b   : > { %v1099_v33 = vmul.f32 %v1092_v32, %v2047_v4  ;;  %v2651_v8 = vmul.f32 %v1088_v49, %v2050_v7  ;;  %1446 = vmatpush.msra.mxu0 %v1133_v30  ;;  %1690 = vmatpush.msra.mxu2 %v2636_v28  ;;  %v1287_v30 = vsel %vm675_vm0, %v2565_v3, %v2569_v6 }
 0x29c   : > { %v1291_v4 = vsel %vm675_vm0, %v2569_v6, %v2565_v3  ;;  %1678 = vmatmul.msk.f32.gmra.mxu2 %vm766_vm5, %v335_v59  ;;  %1682 = vmatmul.msk.f32.gmra.mxu3 %vm766_vm5, %v335_v59  ;;  %v1051_v7 = vsel %vm417_vm4, %v2509_v41, %v2573_v23  ;;  %v1297_v32 = vmul.f32 %v1287_v30, %v1951_v21 }
 0x29d   : > { %1447 = vmatpush.msra.mxu0 %v1099_v33  ;;  %1691 = vmatpush.msra.mxu2 %v2651_v8  ;;  %v2717_v33 = vmul.f32 %v1291_v4, %v1954_v22  ;;  %v2723_v23 = vmul.f32 %v2459_v14, %v2126_v0  ;;  %v1295_v59 = vmul.f32 %v2553_v53, %v1951_v21 }
 0x29e   : > { %v2737_v30 = vmul.f32 %v2557_v55, %v1954_v22  ;;  %v2742_v14 = vmul.f32 %v2477_v25, %v1954_v22  ;;  %v2746_v53 = vmul.f32 %v2497_v38, %v2126_v0  ;;  %v1011_v25 = vsel %vm374_vm7, %v2575_v26, %v2571_v17 }
 0x29f   : > { %1448 = vmatpush.msra.mxu0 %v1097_v9  ;;  %1692 = vmatpush.msra.mxu2 %v2656_v52  ;;  %v1057_v9 = vmul.f32 %v1051_v7, %v2123_v63  ;;  %v1247_v38 = vsel %vm632_vm3, %v2588_v20, %v2567_v5  ;;  %v1251_v4 = vsel %vm632_vm3, %v2567_v5, %v2588_v20 }
 0x2a0   : > { %v1276_v57 = vpop.permute.xlu1 %1275  ;;  %v2795_v5 = vmul.f32 %v1251_v4, %v2089_v12  ;;  %v1255_v20 = vmul.f32 %v2545_v50, %v2086_v11 }
 0x2a1   : > { %v1036_v56 = vpop.permute.xlu0 %1035  ;;  %v1288_v15 = vsel %vm675_vm0, %v1276_v57, %v2577_v27  ;;  %v1292_v42 = vsel %vm675_vm0, %v2577_v27, %v1276_v57  ;;  %1449 = vmatpush.msra.mxu0 %v1095_v10  ;;  %1693 = vmatpush.msra.mxu2 %v2668_v29  ;;  %v1236_v41 = vpop.permute.xlu2 %1235  ;;  %v1055_v10 = vmul.f32 %v2501_v39, %v2123_v63 }
 0x2a2   : > { %v1048_v3 = vsel %vm417_vm4, %v1036_v56, %v1044_v51  ;;  %v1052_v6 = vsel %vm417_vm4, %v1044_v51, %v1036_v56  ;;  %v1299_v47 = vmul.f32 %v1288_v15, %v1951_v21  ;;  %v2702_v58 = vmul.f32 %v1292_v42, %v1954_v22 }
 0x2a3   : > { %v1059_v27 = vmul.f32 %v1052_v6, %v2123_v63  ;;  %v2710_v49 = vmul.f32 %v1048_v3, %v2126_v0  ;;  %1450 = vmatpush.msra.mxu0 %v1093_v37  ;;  %1694 = vmatpush.msra.mxu2 %v2673_v35  ;;  %v1053_v51 = vmul.f32 %v2463_v16, %v2123_v63 }
 0x2a4   : > { %1472 = vmatpush.msra.mxu1 %v1299_v47  ;;  %1703 = vmatpush.msra.mxu3 %v2702_v58  ;;  %v2728_v37 = vmul.f32 %v1047_v40, %v2126_v0  ;;  %v1293_v16 = vmul.f32 %v2473_v24, %v1951_v21  ;;  %v1248_v21 = vsel %vm632_vm3, %v1236_v41, %v2638_v44 }
 0x2a5   : > { %1451 = vmatpush.msra.mxu0 %v1059_v27  ;;  %1695 = vmatpush.msra.mxu2 %v2710_v49  ;;  %v1252_v24 = vsel %vm632_vm3, %v2638_v44, %v1236_v41  ;;  %v1259_v57 = vmul.f32 %v1248_v21, %v2086_v11  ;;  %v1017_v56 = vmul.f32 %v1011_v25, %v2197_v60  ;;  %v3014_v25 = vld [vmem:[#allocation3_spill] sm:$0xff] }
 0x2a6   : > { %1473 = vmatpush.msra.mxu1 %v1297_v32  ;;  %1704 = vmatpush.msra.mxu3 %v2717_v33  ;;  %v2785_v7 = vmul.f32 %v1252_v24, %v2089_v12  ;;  %v2803_v15 = vmul.f32 %v2549_v46, %v2089_v12  ;;  %v1253_v6 = vmul.f32 %v2437_v1, %v2086_v11  ;;  %v3013_v24 = vld [vmem:[#allocation6_spill] sm:$0xff] }
 0x2a7   : > { %1452 = vmatpush.msra.mxu0 %v1057_v9  ;;  %1696 = vmatpush.msra.mxu2 %v2728_v37  ;;  %v2817_v46 = vmul.f32 %v2441_v2, %v2089_v12  ;;  %v1207_v40 = vsel %vm589_vm6, %v2579_v13, %v2533_v48 }
 0x2a8   : > { %1474 = vmatpush.msra.mxu1 %v1295_v59  ;;  %v996_v63 = vpop.permute.xlu1 %995  ;;  %1705 = vmatpush.msra.mxu3 %v2737_v30  ;;  %v1217_v12 = vmul.f32 %v1207_v40, %v2151_v31  ;;  %v3012_v59 = vld [vmem:[#allocation5_spill] sm:$0xff] }
 0x2a9   : > { %v1196_v39 = vpop.permute.xlu0 %1195  ;;  %v1008_v22 = vsel %vm374_vm7, %v996_v63, %v2581_v19  ;;  %v1012_v0 = vsel %vm374_vm7, %v2581_v19, %v996_v63  ;;  %1453 = vmatpush.msra.mxu0 %v1055_v10  ;;  %1697 = vmatpush.msra.mxu2 %v2746_v53  ;;  %v1007_v19 = vsel %vm374_vm7, %v2571_v17, %v2575_v26  ;;  %v1154_v2 = vpop.permute.xlu2 %1153  ;;  %v326_v40 = vld [vmem:[%s2995_s5 + $0x10] sm:$0xff] }
 0x2aa   : > { %v1019_v55 = vmul.f32 %v1012_v0, %v2197_v60  ;;  %v2772_v44 = vmul.f32 %v1008_v22, %v2200_v61  ;;  %1475 = vmatpush.msra.mxu1 %v1293_v16  ;;  %1706 = vmatpush.msra.mxu3 %v2742_v14  ;;  %v1257_v17 = vmul.f32 %v1247_v38, %v2086_v11 }
 0x2ab   : > { %1454 = vmatpush.msra.mxu0 %v1053_v51  ;;  %1698 = vmatpush.msra.mxu2 %v2723_v23  ;;  %v2792_v26 = vmul.f32 %v1007_v19, %v2200_v61  ;;  %v1208_v42 = vsel %vm589_vm6, %v1196_v39, %v2628_v36  ;;  %v1212_v50 = vsel %vm589_vm6, %v2628_v36, %v1196_v39  ;;  %v3011_v51 = vld [vmem:[#allocation8_spill] sm:$0xff] }
 0x2ac   : > { %1476 = vmatpush.msra.mxu1 %v1259_v57  ;;  %1707 = vmatpush.msra.mxu3 %v2785_v7  ;;  %v1211_v11 = vsel %vm589_vm6, %v2533_v48, %v2579_v13  ;;  %v1219_v1 = vmul.f32 %v1208_v42, %v2151_v31  ;;  %v2830_v36 = vmul.f32 %v1212_v50, %v2154_v34  ;;  %v3010_v13 = vld [vmem:[#allocation7_spill] sm:$0xff]  ;;  %v3015_v19 = vld [vmem:[#allocation4_spill] sm:$0xff] }
 0x2ad   : > { %1455 = vmatpush.msra.mxu0 %v1019_v55  ;;  %1699 = vmatpush.msra.mxu2 %v2772_v44  ;;  %v2835_v27 = vmul.f32 %v1211_v11, %v2154_v34  ;;  %v1215_v48 = vmul.f32 %v2513_v43, %v2151_v31  ;;  %v2842_v32 = vmul.f32 %v3010_v13, %v2154_v34 }
 0x2ae   : > { %1477 = vmatpush.msra.mxu1 %v1257_v17  ;;  %1708 = vmatpush.msra.mxu3 %v2795_v5  ;;  %v1213_v16 = vmul.f32 %v3012_v59, %v2151_v31  ;;  %v2859_v39 = vmul.f32 %v3013_v24, %v2154_v34 }
 0x2af   : > { %1456 = vmatpush.msra.mxu0 %v1017_v56  ;;  %1700 = vmatpush.msra.mxu2 %v2792_v26 }
 0x2b0   : > { %v1156_v3 = vpop.permute.xlu1 %1155  ;;  %1478 = vmatpush.msra.mxu1 %v1255_v20  ;;  %1709 = vmatpush.msra.mxu3 %v2803_v15 }
 0x2b1   : > { %v992_v47 = vpop.permute.xlu0 %991  ;;  %v1168_v9 = vsel %vm546_vm8, %v1156_v3, %v3011_v51  ;;  %v1172_v10 = vsel %vm546_vm8, %v3011_v51, %v1156_v3  ;;  %v998_v56 = vpop.permute.xlu2 %997 }
 0x2b2   : > { %1479 = vmatpush.msra.mxu1 %v1253_v6  ;;  %1710 = vmatpush.msra.mxu3 %v2817_v46  ;;  %v1179_v38 = vmul.f32 %v1168_v9, %v3014_v25  ;;  %v2872_v4 = vmul.f32 %v1172_v10, %v3015_v19 }
 0x2b4   : > { %1480 = vmatpush.msra.mxu1 %v1219_v1  ;;  %1711 = vmatpush.msra.mxu3 %v2830_v36 }
 0x2b6   : > { %1481 = vmatpush.msra.mxu1 %v1217_v12  ;;  %1712 = vmatpush.msra.mxu3 %v2835_v27 }
 0x2b8   : > { %v1000_v41 = vpop.permute.xlu1 %999  ;;  %1482 = vmatpush.msra.mxu1 %v1215_v48  ;;  %1713 = vmatpush.msra.mxu3 %v2842_v32 }
 0x2b9   : > { %v1162_v43 = vpop.permute.xlu0 %1161  ;;  %v1006_v21 = vsel %vm374_vm7, %v992_v47, %v1000_v41  ;;  %v1010_v63 = vsel %vm374_vm7, %v1000_v41, %v992_v47  ;;  %v2893_v47 = vld [vmem:[%s2995_s5] sm:$0xff] }
 0x2ba   : > { %v1167_v22 = vsel %vm546_vm8, %v1154_v2, %v1162_v43  ;;  %v1015_v31 = vmul.f32 %v1010_v63, %v2197_v60  ;;  %v2865_v0 = vmul.f32 %v1006_v21, %v2200_v61  ;;  %v1171_v55 = vsel %vm546_vm8, %v1162_v43, %v1154_v2  ;;  %1483 = vmatpush.msra.mxu1 %v1213_v16 }
 0x2bb   : > { %1714 = vmatpush.msra.mxu3 %v2859_v39  ;;  %v1177_v34 = vmul.f32 %v1167_v22, %v3014_v25  ;;  %v2878_v57 = vmul.f32 %v1171_v55, %v3015_v19 }
 0x2bc   : > { %1457 = vmatpush.msra.mxu0 %v1015_v31  ;;  %1484 = vmatpush.msra.mxu1 %v1179_v38  ;;  %v1740_v31 = vld [vmem:[%s1825_s10 + $0x18] sm:$0xff] }
 0x2bd   : > { %1701 = vmatpush.msra.mxu2 %v2865_v0  ;;  %1715 = vmatpush.msra.mxu3 %v2872_v4 }
 0x2be   : > { %1485 = vmatpush.msra.mxu1 %v1177_v34 }
 0x2bf   : > { %1716 = vmatpush.msra.mxu3 %v2878_v57 }
 0x2c0   : > { %v990_v17 = vpop.permute.xlu1 %989 }
 0x2c1   : > { %v1152_v20 = vpop.permute.xlu0 %1151  ;;  %v1005_v42 = vsel %vm374_vm7, %v990_v17, %v998_v56  ;;  %v1009_v3 = vsel %vm374_vm7, %v998_v56, %v990_v17 }
 0x2c2   : > { %v1013_v6 = vmul.f32 %v1009_v3, %v2197_v60  ;;  %v2888_v50 = vmul.f32 %v1005_v42, %v2200_v61  ;;  %v1150_v61 = vpop.permute.xlu2 %1149 }
 0x2c4   : > { %1458 = vmatpush.msra.mxu0 %v1013_v6  ;;  %1702 = vmatpush.msra.mxu2 %v2888_v50 }
 0x2c5   : > { %1459 = vmatmul.f32.vlgmr.msra.gmra.mxu0 %v2893_v47  ;;  %1520 = vmatmul.f32.vlgmr.msra.gmra.mxu2 %v326_v40 }
 0x2c6   : > { %1501 = vmatpush.msrb.mxu0 %v2607_v54 }
 0x2c8   : > { %1502 = vmatpush.msrb.mxu0 %v2617_v62  ;;  %v1160_v60 = vpop.permute.xlu1 %1159  ;;  %v328_v62 = vld [vmem:[%s2995_s5 + $0x20] sm:$0xff] }
 0x2c9   : > { %v1158_v11 = vpop.permute.xlu0 %1157  ;;  %v1166_v1 = vsel %vm546_vm8, %v1152_v20, %v1160_v60  ;;  %v1170_v12 = vsel %vm546_vm8, %v1160_v60, %v1152_v20 }
 0x2ca   : > { %v1165_v2 = vsel %vm546_vm8, %v1150_v61, %v1158_v11  ;;  %v1169_v48 = vsel %vm546_vm8, %v1158_v11, %v1150_v61  ;;  %v1175_v13 = vmul.f32 %v1166_v1, %v3014_v25  ;;  %v1176_v54 = vmul.f32 %v1170_v12, %v3015_v19  ;;  %1503 = vmatpush.msrb.mxu0 %v2625_v45  ;;  %v327_v45 = vld [vmem:[%s2995_s5 + $0x18] sm:$0xff]  ;;  %v1567_v21 = vpop.permute.xlu2 %1566 }
 0x2cb   : > { %v1173_v51 = vmul.f32 %v1165_v2, %v3014_v25  ;;  %v1174_v9 = vmul.f32 %v1169_v48, %v3015_v19  ;;  %v1741_v25 = vld [vmem:[%s1825_s10 + $0x10] sm:$0xff] }
 0x2cc   : > { %1504 = vmatpush.msrb.mxu0 %v2636_v28  ;;  %1486 = vmatpush.msra.mxu1 %v1175_v13  ;;  %v330_v28 = vld [vmem:[%s2995_s5 + $0x30] sm:$0xff] }
 0x2cd   : > { %1717 = vmatpush.msra.mxu3 %v1176_v54  ;;  %1462 = vmatmul.f32.gmra.mxu0 %v326_v40  ;;  %v1743_v40 = vld [vmem:[%s1825_s10 + $0x20] sm:$0xff] }
 0x2ce   : > { %1505 = vmatpush.msrb.mxu0 %v2651_v8  ;;  %1523 = vmatmul.f32.gmra.mxu2 %v328_v62  ;;  %v329_v8 = vld [vmem:[%s2995_s5 + $0x28] sm:$0xff] }
 0x2cf   : > { %1487 = vmatpush.msra.mxu1 %v1173_v51  ;;  %1718 = vmatpush.msra.mxu3 %v1174_v9 }
 0x2d0   : > { %1488 = vmatmul.f32.vlgmr.msra.gmra.mxu1 %v325_v18  ;;  %1506 = vmatpush.msrb.mxu0 %v2656_v52  ;;  %v331_v52 = vld [vmem:[%s2995_s5 + $0x38] sm:$0xff] }
 0x2d1   : > { %1530 = vmatpush.msrb.mxu1 %v2702_v58  ;;  %1549 = vmatmul.f32.vlgmr.msra.gmra.mxu3 %v327_v45  ;;  %v1572_v56 = vpop.permute.xlu0 %1571 }
 0x2d2   : > { %1507 = vmatpush.msrb.mxu0 %v2668_v29 }
 0x2d3   : > { %1531 = vmatpush.msrb.mxu1 %v2717_v33 }
 0x2d4   : > { %1508 = vmatpush.msrb.mxu0 %v2673_v35 }
 0x2d5   : > { %1532 = vmatpush.msrb.mxu1 %v2737_v30  ;;  %1465 = vmatmul.f32.gmra.mxu0 %v328_v62 }
 0x2d6   : > { %1509 = vmatpush.msrb.mxu0 %v2710_v49  ;;  %1526 = vmatmul.f32.gmra.mxu2 %v330_v28  ;;  %v1402_v29 = vpop.f32.mrf.mxu2  ;;  %v2961_v35 = vpop.f32.mrf.mxu3 }
 0x2d7   : > { %1533 = vmatpush.msrb.mxu1 %v2742_v14 }
 0x2d8   : > { %1491 = vmatmul.f32.gmra.mxu1 %v327_v45  ;;  %1510 = vmatpush.msrb.mxu0 %v2728_v37  ;;  %v1745_v45 = vld [vmem:[%s1825_s10 + $0x30] sm:$0xff] }
 0x2d9   : > { %1534 = vmatpush.msrb.mxu1 %v2785_v7  ;;  %1552 = vmatmul.f32.gmra.mxu3 %v329_v8 }
 0x2da   : > { %1511 = vmatpush.msrb.mxu0 %v2746_v53 }
 0x2db   : > { %1535 = vmatpush.msrb.mxu1 %v2795_v5 }
 0x2dc   : > { %1512 = vmatpush.msrb.mxu0 %v2723_v23 }
 0x2dd   : > { %1536 = vmatpush.msrb.mxu1 %v2803_v15  ;;  %1468 = vmatmul.f32.gmra.mxu0 %v330_v28  ;;  %v1562_v15 = vpop.permute.xlu1 %1561 }
 0x2de   : > { %1513 = vmatpush.msrb.mxu0 %v2772_v44 }
 0x2df   : > { %1537 = vmatpush.msrb.mxu1 %v2817_v46 }
 0x2e0   : > { %1494 = vmatmul.f32.gmra.mxu1 %v329_v8  ;;  %1514 = vmatpush.msrb.mxu0 %v2792_v26 }
 0x2e1   : > { %1538 = vmatpush.msrb.mxu1 %v2830_v36  ;;  %1555 = vmatmul.f32.gmra.mxu3 %v331_v52  ;;  %v1739_v36 = vld [vmem:[%s1825_s10] sm:$0xff] }
 0x2e2   : > { %1515 = vmatpush.msrb.mxu0 %v2865_v0 }
 0x2e3   : > { %1539 = vmatpush.msrb.mxu1 %v2835_v27 }
 0x2e4   : > { %1516 = vmatpush.msrb.mxu0 %v2888_v50  ;;  %v1742_v50 = vld [vmem:[%s1825_s10 + $0x28] sm:$0xff] }
 0x2e5   : > { %1540 = vmatpush.msrb.mxu1 %v2842_v32  ;;  %1517 = vmatmul.f32.vlgmr.msrb.gmra.mxu0 %v2893_v47  ;;  %v1405_v58 = vpop.f32.mrf.mxu2  ;;  %v1434_v49 = vpop.f32.mrf.mxu3 }
 0x2e6   : > { %v1577_v48 = vpop.permute.xlu1 %1576 }
 0x2e7   : > { %1541 = vmatpush.msrb.mxu1 %v2859_v39 }
 0x2e8   : > { %1497 = vmatmul.f32.gmra.mxu1 %v331_v52 }
 0x2e9   : > { %1542 = vmatpush.msrb.mxu1 %v2872_v4 }
 0x2eb   : > { %1543 = vmatpush.msrb.mxu1 %v2878_v57 }
 0x2ed   : > { %1544 = vmatpush.msrb.mxu1 %v1176_v54 }
 0x2ef   : > { %1545 = vmatpush.msrb.mxu1 %v1174_v9  ;;  %v1744_v9 = vld [vmem:[%s1825_s10 + $0x38] sm:$0xff] }
 0x2f0   : > { %1546 = vmatmul.f32.vlgmr.msrb.gmra.mxu1 %v325_v18 }
 0x317   : > { %v1408_v33 = vpop.f32.mrf.mxu2  ;;  %v1437_v23 = vpop.f32.mrf.mxu3 }
 0x31f   : > { %v1411_v37 = vpop.f32.mrf.mxu2  ;;  %v1440_v14 = vpop.f32.mrf.mxu3 }
 0x342   : > { %v1460_v30 = vpop.f32.mrf.mxu0 }
 0x343   : > { %v1461_v44 = vadd.f32 %v1460_v30, %v1402_v29 }
 0x348   : > { %v1521_v7 = vpop.f32.mrf.mxu2 }
 0x349   : > { %v1522_v32 = vadd.f32 %v1521_v7, %v1434_v49  ;;  %v1746_v49 = vld [vmem:[%s1825_s10 + $0x8] sm:$0xff] }
 0x34a   : > { %v1463_v53 = vpop.f32.mrf.mxu0 }
 0x34b   : > { %v1464_v41 = vadd.f32 %v1463_v53, %v1405_v58 }
 0x34d   : > { %v1489_v26 = vpop.f32.mrf.mxu1 }
 0x34e   : > { %v1490_v5 = vadd.f32 %v1489_v26, %v1461_v44 }
 0x350   : > { %v1579_v46 = vadd.f32 %v1562_v15, %v1490_v5 }
 0x351   : > { %v1524_v63 = vpop.f32.mrf.mxu2 }
 0x352   : > { %v1587_v27 = vadd.f32 %v1739_v36, %v1579_v46  ;;  %v1466_v16 = vpop.f32.mrf.mxu0  ;;  %v1525_v55 = vadd.f32 %v1524_v63, %v1437_v23 }
 0x353   : > { %v1467_v19 = vadd.f32 %v1466_v16, %v1408_v33 }
 0x354   : > { %1595 = vst [vmem:[%s2968_s23] sm:$0xff] %v1587_v27  ;;  %v1550_v59 = vpop.f32.mrf.mxu3 }
 0x355   : > { %v1551_v10 = vadd.f32 %v1550_v59, %v1522_v32  ;;  %v1492_v43 = vpop.f32.mrf.mxu1 }
 0x356   : > { %v1493_v24 = vadd.f32 %v1492_v43, %v1464_v41 }
 0x357   : > { %v1582_v39 = vadd.f32 %v1567_v21, %v1551_v10 }
 0x358   : > { %v1581_v22 = vadd.f32 %v1567_v21, %v1493_v24 }
 0x359   : > { %v1590_v0 = vadd.f32 %v1740_v31, %v1582_v39  ;;  %v1527_v3 = vpop.f32.mrf.mxu2 }
 0x35a   : > { %v1589_v38 = vadd.f32 %v1741_v25, %v1581_v22  ;;  %v1469_v20 = vpop.f32.mrf.mxu0  ;;  %v1528_v61 = vadd.f32 %v1527_v3, %v1440_v14 }
 0x35b   : > { %1598 = vst [vmem:[%s2968_s23 + $0x18] sm:$0xff] %v1590_v0  ;;  %v1470_v11 = vadd.f32 %v1469_v20, %v1411_v37 }
 0x35c   : > { %1597 = vst [vmem:[%s2968_s23 + $0x10] sm:$0xff] %v1589_v38  ;;  %v1553_v4 = vpop.f32.mrf.mxu3 }
 0x35d   : > { %v1554_v34 = vadd.f32 %v1553_v4, %v1525_v55  ;;  %v1495_v57 = vpop.f32.mrf.mxu1 }
 0x35e   : > { %v1496_v17 = vadd.f32 %v1495_v57, %v1467_v19 }
 0x35f   : > { %v1584_v42 = vadd.f32 %v1572_v56, %v1554_v34 }
 0x360   : > { %v1583_v6 = vadd.f32 %v1572_v56, %v1496_v17 }
 0x361   : > { %v1592_v47 = vadd.f32 %v1742_v50, %v1584_v42 }
 0x362   : > { %v1591_v60 = vadd.f32 %v1743_v40, %v1583_v6  ;;  %v1518_v51 = vpop.f32.mrf.mxu0 }
 0x363   : > { %1600 = vst [vmem:[%s2968_s23 + $0x28] sm:$0xff] %v1592_v47  ;;  %v1519_v8 = vadd.f32 %v1518_v51, %v2961_v35 }
 0x364   : > { %1599 = vst [vmem:[%s2968_s23 + $0x20] sm:$0xff] %v1591_v60  ;;  %v1556_v1 = vpop.f32.mrf.mxu3 }
 0x365   : > { %v1557_v12 = vadd.f32 %v1556_v1, %v1528_v61  ;;  %v1498_v2 = vpop.f32.mrf.mxu1 }
 0x366   : > { %v1499_v13 = vadd.f32 %v1498_v2, %v1470_v11 }
 0x367   : > { %v1586_v54 = vadd.f32 %v1577_v48, %v1557_v12 }
 0x368   : > { %v1585_v62 = vadd.f32 %v1577_v48, %v1499_v13 }
 0x369   : > { %v1594_v18 = vadd.f32 %v1744_v9, %v1586_v54 }
 0x36a   : > { %v1593_v28 = vadd.f32 %v1745_v45, %v1585_v62 }
 0x36b   : > { %1602 = vst [vmem:[%s2968_s23 + $0x38] sm:$0xff] %v1594_v18 }
 0x36c   : > { %1601 = vst [vmem:[%s2968_s23 + $0x30] sm:$0xff] %v1593_v28 }
 0x36d   : > { %v1547_v52 = vpop.f32.mrf.mxu1 }
 0x36e   : > { %v1548_v29 = vadd.f32 %v1547_v52, %v1519_v8 }
 0x370   : > { %v1580_v58 = vadd.f32 %v1562_v15, %v1548_v29 }
 0x372   : > { %v1588_v33 = vadd.f32 %v1746_v49, %v1580_v58 }
 0x374   : > { %1596 = vst [vmem:[%s2968_s23 + $0x8] sm:$0xff] %v1588_v33 }
 0x375 PF: > { %s18_s27 = sadd.s32 1, %s1753_s27  }
 0x376   : > { %p15_p4 = scmp.ge.s32.totalorder %s18_s27, 4  }
 0x378   :  { %17 = sbr.rel (!%p15_p4) target bundleno = 1 (0x1), region = 82 }

</bundles_post_ra>
